<compile_context>
chip_gen: v7x
topology: tpu7x:2x2x1
jax: 0.10.0
libtpu: 0.0.40
codegen_flags: <defaults>
</compile_context>

<pallas_src>
import jax
import jax.numpy as jnp
from jax.experimental import pallas as pl
from jax.experimental.pallas import tpu as pltpu  # noqa: F401  (TPU backend)

LANE = 128  # pad all feature dims to the 128-lane vreg width


# ---------------------------------------------------------------------------
# helpers
# ---------------------------------------------------------------------------
def _pad_to(x, shape):
    return jnp.pad(x, [(0, t - s) for s, t in zip(x.shape, shape)])


def _full_spec(arr):
    shape = arr.shape
    nd = len(shape)
    return pl.BlockSpec(shape, lambda *_: (0,) * nd)


# ---------------------------------------------------------------------------
# Fused forward kernel: GCN1 + GCN2 + concat + FC head, single invocation
# ---------------------------------------------------------------------------
def make_biclassifier_kernel(n_sage, n_fcn):
    def kernel(*refs):
        (feat1_ref, feat2_ref, blocks1_ref, blocks2_ref,
         invdeg1_ref, invdeg2_ref) = refs[0:6]
        fc1_w, fc1_b, sage1_w, sage1_b = refs[6:10]
        fc2_w, fc2_b, sage2_w, sage2_b = refs[10:14]
        head_refs = refs[14:14 + 2 * n_fcn]
        out_ref = refs[14 + 2 * n_fcn]

        def gcn_branch(feat_ref, blocks_ref, invdeg_ref, fcw_ref, fcb_ref, sw_ref, sb_ref):
            # h = relu(fc_init(features))
            h = jnp.dot(feat_ref[...], fcw_ref[...],
                        preferred_element_type=jnp.float32) + fcb_ref[...]
            h = jnp.maximum(h, 0.0)
            # stacked SAGEConv layers (aggregator='mean', combine='sum'), fused in-kernel.
            # TODO(synk): nn.Dropout between GCN layers — identity in eval mode.
            for l in range(n_sage):
                a = blocks_ref[l]                      # [N, N] bf16 (0/1 adjacency)
                inv_deg = invdeg_ref[l]                # [N, 1] f32, 1/max(deg, 1)
                # neighbor mean: bf16 x bf16 MXU matmul, f32 accumulate, f32 scaling
                h_neigh = jnp.dot(a, h.astype(jnp.bfloat16),
                                  preferred_element_type=jnp.float32) * inv_deg
                # merged self+neighbor projection: single MXU matmul with stacked weights
                hcat = jnp.concatenate([h, h_neigh], axis=1)          # [N, 2*LANE]
                y = jnp.dot(hcat, sw_ref[l],
                            preferred_element_type=jnp.float32) + sb_ref[l]
                h = jnp.maximum(y, 0.0) if l != n_sage - 1 else y     # no act on last layer
            return h

        g1 = gcn_branch(feat1_ref, blocks1_ref, invdeg1_ref, fc1_w, fc1_b, sage1_w, sage1_b)
        g2 = gcn_branch(feat2_ref, blocks2_ref, invdeg2_ref, fc2_w, fc2_b, sage2_w, sage2_b)

        # combine_type == 'concat'
        h = jnp.concatenate([g1, g2], axis=1)                          # [N, 2*LANE]

        # FC head: h = layers3[i](relu(h)) for i < n_fcn-1, then h = layers3[-1](h)
        for j in range(n_fcn - 1):
            # TODO(synk): nn.Dropout(p=0.5) — identity in eval mode; stochastic mask omitted.
            w = head_refs[2 * j][...]
            b = head_refs[2 * j + 1][...]
            h = jnp.dot(jnp.maximum(h, 0.0), w,
                        preferred_element_type=jnp.float32) + b
        w = head_refs[2 * (n_fcn - 1)][...]
        b = head_refs[2 * (n_fcn - 1) + 1][...]
        h = jnp.dot(h, w, preferred_element_type=jnp.float32) + b

        out_ref[...] = h.astype(out_ref.dtype)

    return kernel


# ---------------------------------------------------------------------------
# Parameter construction (true shapes, then zero-padded/stacked for the kernel)
# ---------------------------------------------------------------------------
def init_params(key, in_dim, hidden, gcn_out, n_layers, n_fcn, out_dim):
    P = LANE

    def dense(k, shape):
        # deterministic stand-in for torch's default uniform init
        return jax.random.normal(k, shape, jnp.float32) / jnp.sqrt(float(shape[0]))

    def init_gcn(k):
        k, kf, kb = jax.random.split(k, 3)
        fc_w = dense(kf, (in_dim, hidden))
        fc_b = jax.random.normal(kb, (hidden,), jnp.float32) * 0.01
        dims = [hidden] * (n_layers + 1) + [gcn_out]
        sw, sb = [], []
        for i in range(n_layers + 1):
            d_in, d_out = dims[i], dims[i + 1]
            k, k1, k2, k3 = jax.random.split(k, 4)
            w_self = dense(k1, (d_in, d_out))
            w_neigh = dense(k2, (d_in, d_out))
            b = jax.random.normal(k3, (d_out,), jnp.float32) * 0.01
            # stacked + lane-padded weight for the merged [h | h_neigh] matmul
            w_cat = jnp.zeros((2 * P, P), jnp.float32)
            w_cat = w_cat.at[:d_in, :d_out].set(w_self)
            w_cat = w_cat.at[P:P + d_in, :d_out].set(w_neigh)
            sw.append(w_cat)
            sb.append(_pad_to(b.reshape(1, d_out), (1, P)))
        return {
            "fc_w": _pad_to(fc_w, (P, P)),
            "fc_b": _pad_to(fc_b.reshape(1, hidden), (1, P)),
            "sage_w": jnp.stack(sw),          # [L, 2P, P]
            "sage_b": jnp.stack(sb),          # [L, 1, P]
        }

    k1, k2, k3 = jax.random.split(key, 3)
    params = {"gcn1": init_gcn(k1), "gcn2": init_gcn(k2)}

    # FC head: hidden_dim = 2 * gcn_out (concat), halved n_fcn-1 times, then -> out_dim
    head_dims, hd = [], 2 * gcn_out
    for _ in range(n_fcn - 1):
        head_dims.append((hd, hd // 2))
        hd = hd // 2
    head_dims.append((hd, out_dim))

    head, k = [], k3
    for i, (d_in, d_out) in enumerate(head_dims):
        k, kw, kb = jax.random.split(k, 3)
        w = dense(kw, (d_in, d_out))
        b = jax.random.normal(kb, (d_out,), jnp.float32) * 0.01
        if i == 0:
            # first head layer consumes the concat of the two padded GCN outputs:
            # rows [0:gcn_out) <-> GCN1 output, rows [P:P+gcn_out) <-> GCN2 output
            w_p = jnp.zeros((2 * P, P), jnp.float32)
            w_p = w_p.at[:gcn_out, :d_out].set(w[:gcn_out])
            w_p = w_p.at[P:P + gcn_out, :d_out].set(w[gcn_out:])
        else:
            w_p = _pad_to(w, (P, P))
        head.append((w_p, _pad_to(b.reshape(1, d_out), (1, P))))
    params["head"] = head
    return params


# ---------------------------------------------------------------------------
# Forward wrapper (single pallas_call)
# ---------------------------------------------------------------------------
def biclassifier_forward(params, in_blocks, in_feats, out_blocks, out_feats,
                         *, n_layers, n_fcn, out_dim):
    n_sage = n_layers + 1
    N = in_feats.shape[0]
    P = LANE

    # Graph-structure preprocessing (reused every forward in a real pipeline):
    # f32 1/max(deg,1) so the neighbor mean stays exact, adjacency fed to MXU in bf16.
    def inv_degree(blocks):                               # [L, N, N] -> [L, N, 1] f32
        deg = jnp.sum(blocks, axis=2, keepdims=True)
        return 1.0 / jnp.maximum(deg, 1.0)

    # TODO(synk): BiClassifier_incp re-slices out_blocks[i:] in a loop but only the last
    # iteration's embedding reaches the head; GCN2 is run once over the full block stack.
    inputs = [
        _pad_to(in_feats, (N, P)),
        _pad_to(out_feats, (N, P)),
        in_blocks.astype(jnp.bfloat16),
        out_blocks.astype(jnp.bfloat16),
        inv_degree(in_blocks),
        inv_degree(out_blocks),
        params["gcn1"]["fc_w"], params["gcn1"]["fc_b"],
        params["gcn1"]["sage_w"], params["gcn1"]["sage_b"],
        params["gcn2"]["fc_w"], params["gcn2"]["fc_b"],
        params["gcn2"]["sage_w"], params["gcn2"]["sage_b"],
    ]
    for w, b in params["head"]:
        inputs += [w, b]

    out_p = pl.pallas_call(
        make_biclassifier_kernel(n_sage, n_fcn),
        out_shape=jax.ShapeDtypeStruct((N, P), jnp.float32),   # lane-dense output tile
        in_specs=[_full_spec(x) for x in inputs],
        out_specs=pl.BlockSpec((N, P), lambda *_: (0, 0)),
    )(*inputs)

    h = out_p[:, :out_dim]
    if out_dim == 1:        # torch .squeeze(-1): only squeezes when the last dim is 1
        h = h[:, 0]
    return [h]              # BiClassifier_incp returns `predicts` (a list)


# ---------------------------------------------------------------------------
# Main
# ---------------------------------------------------------------------------
if __name__ == "__main__":
    key = jax.random.PRNGKey(0)

    N = 64            # nodes per block
    IN_DIM = 16       # node-type feature width
    HIDDEN = 32       # GCN hidden dim
    GCN_OUT = 16      # GCN out_dim (per branch)
    N_LAYERS = 2      # -> 3 SAGEConv layers per GCN branch
    N_FCN = 2         # FC head depth
    OUT_DIM = 2       # classifier output dim
    L = N_LAYERS + 1

    key, kf1, kf2, kp = jax.random.split(key, 4)
    in_feats = jax.random.normal(kf1, (N, IN_DIM), jnp.float32)
    out_feats = jax.random.normal(kf2, (N, IN_DIM), jnp.float32)

    def rand_blocks(k):
        blks = []
        for _ in range(L):
            k, ka = jax.random.split(k)
            a = (jax.random.uniform(ka, (N, N)) < 0.1).astype(jnp.float32)
            a = a * (1.0 - jnp.eye(N, dtype=jnp.float32))      # no self loops
            blks.append(a)
        return k, jnp.stack(blks)                              # [L, N, N]

    key, in_blocks = rand_blocks(key)
    key, out_blocks = rand_blocks(key)

    params = init_params(kp, IN_DIM, HIDDEN, GCN_OUT, N_LAYERS, N_FCN, OUT_DIM)

    predicts = biclassifier_forward(
        params, in_blocks, in_feats, out_blocks, out_feats,
        n_layers=N_LAYERS, n_fcn=N_FCN, out_dim=OUT_DIM)
    out = jax.block_until_ready(predicts[0])

    assert out.shape == (N, OUT_DIM), out.shape
    assert bool(jnp.all(jnp.isfinite(out)))
    print("KERNEL_OK")
</pallas_src>

<mosaic_0001>
module attributes {stable_mosaic.version = 11 : i64} {
  func.func @kernel(%arg0: memref<64x128xf32, #tpu.memory_space<vmem>>, %arg1: memref<64x128xf32, #tpu.memory_space<vmem>>, %arg2: memref<3x64x64xbf16, #tpu.memory_space<vmem>>, %arg3: memref<3x64x64xbf16, #tpu.memory_space<vmem>>, %arg4: memref<3x64x1xf32, #tpu.memory_space<vmem>>, %arg5: memref<3x64x1xf32, #tpu.memory_space<vmem>>, %arg6: memref<128x128xf32, #tpu.memory_space<vmem>>, %arg7: memref<1x128xf32, #tpu.memory_space<vmem>>, %arg8: memref<3x256x128xf32, #tpu.memory_space<vmem>>, %arg9: memref<3x1x128xf32, #tpu.memory_space<vmem>>, %arg10: memref<128x128xf32, #tpu.memory_space<vmem>>, %arg11: memref<1x128xf32, #tpu.memory_space<vmem>>, %arg12: memref<3x256x128xf32, #tpu.memory_space<vmem>>, %arg13: memref<3x1x128xf32, #tpu.memory_space<vmem>>, %arg14: memref<256x128xf32, #tpu.memory_space<vmem>>, %arg15: memref<1x128xf32, #tpu.memory_space<vmem>>, %arg16: memref<128x128xf32, #tpu.memory_space<vmem>>, %arg17: memref<1x128xf32, #tpu.memory_space<vmem>>, %arg18: memref<64x128xf32, #tpu.memory_space<vmem>>) attributes {dimension_semantics = [], scalar_prefetch = 0 : i64, scratch_operands = 0 : i64, tpu.core_type = #tpu.core_type<tc>} {
    %c0 = arith.constant 0 : index
    %c0_0 = arith.constant 0 : index
    %0 = vector.load %arg0[%c0, %c0_0] : memref<64x128xf32, #tpu.memory_space<vmem>>, vector<64x128xf32>
    %c0_1 = arith.constant 0 : index
    %c0_2 = arith.constant 0 : index
    %1 = vector.load %arg6[%c0_1, %c0_2] : memref<128x128xf32, #tpu.memory_space<vmem>>, vector<128x128xf32>
    %cst = arith.constant dense<0.000000e+00> : vector<64x128xf32>
    %2 = tpu.matmul %0, %1, %cst {dimension_numbers = #tpu.dot_dimension_numbers<[1], [0], [0], [1], [0, 0, 1, 1], [], []>} : vector<64x128xf32>, vector<128x128xf32>, vector<64x128xf32> -> vector<64x128xf32>
    %c0_3 = arith.constant 0 : index
    %c0_4 = arith.constant 0 : index
    %3 = vector.load %arg7[%c0_3, %c0_4] : memref<1x128xf32, #tpu.memory_space<vmem>>, vector<1x128xf32>
    %4 = vector.broadcast %3 : vector<1x128xf32> to vector<64x128xf32>
    %5 = arith.addf %2, %4 : vector<64x128xf32>
    %cst_5 = arith.constant 0.000000e+00 : f32
    %6 = vector.broadcast %cst_5 : f32 to vector<64x128xf32>
    %7 = arith.maximumf %5, %6 : vector<64x128xf32>
    %c0_6 = arith.constant 0 : index
    %c0_7 = arith.constant 0 : index
    %c0_8 = arith.constant 0 : index
    %8 = vector.load %arg2[%c0_6, %c0_7, %c0_8] : memref<3x64x64xbf16, #tpu.memory_space<vmem>>, vector<1x64x64xbf16>
    %9 = vector.shape_cast %8 : vector<1x64x64xbf16> to vector<64x64xbf16>
    %c0_9 = arith.constant 0 : index
    %c0_10 = arith.constant 0 : index
    %c0_11 = arith.constant 0 : index
    %10 = vector.load %arg4[%c0_9, %c0_10, %c0_11] : memref<3x64x1xf32, #tpu.memory_space<vmem>>, vector<1x64x1xf32>
    %11 = vector.shape_cast %10 : vector<1x64x1xf32> to vector<64x1xf32>
    %12 = arith.truncf %7 : vector<64x128xf32> to vector<64x128xbf16>
    %cst_12 = arith.constant dense<0.000000e+00> : vector<64x128xf32>
    %13 = tpu.matmul %9, %12, %cst_12 {dimension_numbers = #tpu.dot_dimension_numbers<[1], [0], [0], [1], [0, 0, 1, 1], [], []>} : vector<64x64xbf16>, vector<64x128xbf16>, vector<64x128xf32> -> vector<64x128xf32>
    %14 = vector.broadcast %11 : vector<64x1xf32> to vector<64x128xf32>
    %15 = arith.mulf %13, %14 : vector<64x128xf32>
    %16 = tpu.concatenate %7, %15 in 1 : vector<64x128xf32>, vector<64x128xf32> -> vector<64x256xf32>
    %c0_13 = arith.constant 0 : index
    %c0_14 = arith.constant 0 : index
    %c0_15 = arith.constant 0 : index
    %17 = vector.load %arg8[%c0_13, %c0_14, %c0_15] : memref<3x256x128xf32, #tpu.memory_space<vmem>>, vector<1x256x128xf32>
    %18 = vector.shape_cast %17 : vector<1x256x128xf32> to vector<256x128xf32>
    %cst_16 = arith.constant dense<0.000000e+00> : vector<64x128xf32>
    %19 = tpu.matmul %16, %18, %cst_16 {dimension_numbers = #tpu.dot_dimension_numbers<[1], [0], [0], [1], [0, 0, 1, 1], [], []>} : vector<64x256xf32>, vector<256x128xf32>, vector<64x128xf32> -> vector<64x128xf32>
    %c0_17 = arith.constant 0 : index
    %c0_18 = arith.constant 0 : index
    %c0_19 = arith.constant 0 : index
    %20 = vector.load %arg9[%c0_17, %c0_18, %c0_19] : memref<3x1x128xf32, #tpu.memory_space<vmem>>, vector<1x1x128xf32>
    %21 = vector.shape_cast %20 : vector<1x1x128xf32> to vector<1x128xf32>
    %22 = vector.broadcast %21 : vector<1x128xf32> to vector<64x128xf32>
    %23 = arith.addf %19, %22 : vector<64x128xf32>
    %cst_20 = arith.constant 0.000000e+00 : f32
    %24 = vector.broadcast %cst_20 : f32 to vector<64x128xf32>
    %25 = arith.maximumf %23, %24 : vector<64x128xf32>
    %c1 = arith.constant 1 : index
    %c0_21 = arith.constant 0 : index
    %c0_22 = arith.constant 0 : index
    %26 = vector.load %arg2[%c1, %c0_21, %c0_22] : memref<3x64x64xbf16, #tpu.memory_space<vmem>>, vector<1x64x64xbf16>
    %27 = vector.shape_cast %26 : vector<1x64x64xbf16> to vector<64x64xbf16>
    %c1_23 = arith.constant 1 : index
    %c0_24 = arith.constant 0 : index
    %c0_25 = arith.constant 0 : index
    %28 = vector.load %arg4[%c1_23, %c0_24, %c0_25] : memref<3x64x1xf32, #tpu.memory_space<vmem>>, vector<1x64x1xf32>
    %29 = vector.shape_cast %28 : vector<1x64x1xf32> to vector<64x1xf32>
    %30 = arith.truncf %25 : vector<64x128xf32> to vector<64x128xbf16>
    %cst_26 = arith.constant dense<0.000000e+00> : vector<64x128xf32>
    %31 = tpu.matmul %27, %30, %cst_26 {dimension_numbers = #tpu.dot_dimension_numbers<[1], [0], [0], [1], [0, 0, 1, 1], [], []>} : vector<64x64xbf16>, vector<64x128xbf16>, vector<64x128xf32> -> vector<64x128xf32>
    %32 = vector.broadcast %29 : vector<64x1xf32> to vector<64x128xf32>
    %33 = arith.mulf %31, %32 : vector<64x128xf32>
    %34 = tpu.concatenate %25, %33 in 1 : vector<64x128xf32>, vector<64x128xf32> -> vector<64x256xf32>
    %c1_27 = arith.constant 1 : index
    %c0_28 = arith.constant 0 : index
    %c0_29 = arith.constant 0 : index
    %35 = vector.load %arg8[%c1_27, %c0_28, %c0_29] : memref<3x256x128xf32, #tpu.memory_space<vmem>>, vector<1x256x128xf32>
    %36 = vector.shape_cast %35 : vector<1x256x128xf32> to vector<256x128xf32>
    %cst_30 = arith.constant dense<0.000000e+00> : vector<64x128xf32>
    %37 = tpu.matmul %34, %36, %cst_30 {dimension_numbers = #tpu.dot_dimension_numbers<[1], [0], [0], [1], [0, 0, 1, 1], [], []>} : vector<64x256xf32>, vector<256x128xf32>, vector<64x128xf32> -> vector<64x128xf32>
    %c1_31 = arith.constant 1 : index
    %c0_32 = arith.constant 0 : index
    %c0_33 = arith.constant 0 : index
    %38 = vector.load %arg9[%c1_31, %c0_32, %c0_33] : memref<3x1x128xf32, #tpu.memory_space<vmem>>, vector<1x1x128xf32>
    %39 = vector.shape_cast %38 : vector<1x1x128xf32> to vector<1x128xf32>
    %40 = vector.broadcast %39 : vector<1x128xf32> to vector<64x128xf32>
    %41 = arith.addf %37, %40 : vector<64x128xf32>
    %cst_34 = arith.constant 0.000000e+00 : f32
    %42 = vector.broadcast %cst_34 : f32 to vector<64x128xf32>
    %43 = arith.maximumf %41, %42 : vector<64x128xf32>
    %c2 = arith.constant 2 : index
    %c0_35 = arith.constant 0 : index
    %c0_36 = arith.constant 0 : index
    %44 = vector.load %arg2[%c2, %c0_35, %c0_36] : memref<3x64x64xbf16, #tpu.memory_space<vmem>>, vector<1x64x64xbf16>
    %45 = vector.shape_cast %44 : vector<1x64x64xbf16> to vector<64x64xbf16>
    %c2_37 = arith.constant 2 : index
    %c0_38 = arith.constant 0 : index
    %c0_39 = arith.constant 0 : index
    %46 = vector.load %arg4[%c2_37, %c0_38, %c0_39] : memref<3x64x1xf32, #tpu.memory_space<vmem>>, vector<1x64x1xf32>
    %47 = vector.shape_cast %46 : vector<1x64x1xf32> to vector<64x1xf32>
    %48 = arith.truncf %43 : vector<64x128xf32> to vector<64x128xbf16>
    %cst_40 = arith.constant dense<0.000000e+00> : vector<64x128xf32>
    %49 = tpu.matmul %45, %48, %cst_40 {dimension_numbers = #tpu.dot_dimension_numbers<[1], [0], [0], [1], [0, 0, 1, 1], [], []>} : vector<64x64xbf16>, vector<64x128xbf16>, vector<64x128xf32> -> vector<64x128xf32>
    %50 = vector.broadcast %47 : vector<64x1xf32> to vector<64x128xf32>
    %51 = arith.mulf %49, %50 : vector<64x128xf32>
    %52 = tpu.concatenate %43, %51 in 1 : vector<64x128xf32>, vector<64x128xf32> -> vector<64x256xf32>
    %c2_41 = arith.constant 2 : index
    %c0_42 = arith.constant 0 : index
    %c0_43 = arith.constant 0 : index
    %53 = vector.load %arg8[%c2_41, %c0_42, %c0_43] : memref<3x256x128xf32, #tpu.memory_space<vmem>>, vector<1x256x128xf32>
    %54 = vector.shape_cast %53 : vector<1x256x128xf32> to vector<256x128xf32>
    %cst_44 = arith.constant dense<0.000000e+00> : vector<64x128xf32>
    %55 = tpu.matmul %52, %54, %cst_44 {dimension_numbers = #tpu.dot_dimension_numbers<[1], [0], [0], [1], [0, 0, 1, 1], [], []>} : vector<64x256xf32>, vector<256x128xf32>, vector<64x128xf32> -> vector<64x128xf32>
    %c2_45 = arith.constant 2 : index
    %c0_46 = arith.constant 0 : index
    %c0_47 = arith.constant 0 : index
    %56 = vector.load %arg9[%c2_45, %c0_46, %c0_47] : memref<3x1x128xf32, #tpu.memory_space<vmem>>, vector<1x1x128xf32>
    %57 = vector.shape_cast %56 : vector<1x1x128xf32> to vector<1x128xf32>
    %58 = vector.broadcast %57 : vector<1x128xf32> to vector<64x128xf32>
    %59 = arith.addf %55, %58 : vector<64x128xf32>
    %c0_48 = arith.constant 0 : index
    %c0_49 = arith.constant 0 : index
    %60 = vector.load %arg1[%c0_48, %c0_49] : memref<64x128xf32, #tpu.memory_space<vmem>>, vector<64x128xf32>
    %c0_50 = arith.constant 0 : index
    %c0_51 = arith.constant 0 : index
    %61 = vector.load %arg10[%c0_50, %c0_51] : memref<128x128xf32, #tpu.memory_space<vmem>>, vector<128x128xf32>
    %cst_52 = arith.constant dense<0.000000e+00> : vector<64x128xf32>
    %62 = tpu.matmul %60, %61, %cst_52 {dimension_numbers = #tpu.dot_dimension_numbers<[1], [0], [0], [1], [0, 0, 1, 1], [], []>} : vector<64x128xf32>, vector<128x128xf32>, vector<64x128xf32> -> vector<64x128xf32>
    %c0_53 = arith.constant 0 : index
    %c0_54 = arith.constant 0 : index
    %63 = vector.load %arg11[%c0_53, %c0_54] : memref<1x128xf32, #tpu.memory_space<vmem>>, vector<1x128xf32>
    %64 = vector.broadcast %63 : vector<1x128xf32> to vector<64x128xf32>
    %65 = arith.addf %62, %64 : vector<64x128xf32>
    %cst_55 = arith.constant 0.000000e+00 : f32
    %66 = vector.broadcast %cst_55 : f32 to vector<64x128xf32>
    %67 = arith.maximumf %65, %66 : vector<64x128xf32>
    %c0_56 = arith.constant 0 : index
    %c0_57 = arith.constant 0 : index
    %c0_58 = arith.constant 0 : index
    %68 = vector.load %arg3[%c0_56, %c0_57, %c0_58] : memref<3x64x64xbf16, #tpu.memory_space<vmem>>, vector<1x64x64xbf16>
    %69 = vector.shape_cast %68 : vector<1x64x64xbf16> to vector<64x64xbf16>
    %c0_59 = arith.constant 0 : index
    %c0_60 = arith.constant 0 : index
    %c0_61 = arith.constant 0 : index
    %70 = vector.load %arg5[%c0_59, %c0_60, %c0_61] : memref<3x64x1xf32, #tpu.memory_space<vmem>>, vector<1x64x1xf32>
    %71 = vector.shape_cast %70 : vector<1x64x1xf32> to vector<64x1xf32>
    %72 = arith.truncf %67 : vector<64x128xf32> to vector<64x128xbf16>
    %cst_62 = arith.constant dense<0.000000e+00> : vector<64x128xf32>
    %73 = tpu.matmul %69, %72, %cst_62 {dimension_numbers = #tpu.dot_dimension_numbers<[1], [0], [0], [1], [0, 0, 1, 1], [], []>} : vector<64x64xbf16>, vector<64x128xbf16>, vector<64x128xf32> -> vector<64x128xf32>
    %74 = vector.broadcast %71 : vector<64x1xf32> to vector<64x128xf32>
    %75 = arith.mulf %73, %74 : vector<64x128xf32>
    %76 = tpu.concatenate %67, %75 in 1 : vector<64x128xf32>, vector<64x128xf32> -> vector<64x256xf32>
    %c0_63 = arith.constant 0 : index
    %c0_64 = arith.constant 0 : index
    %c0_65 = arith.constant 0 : index
    %77 = vector.load %arg12[%c0_63, %c0_64, %c0_65] : memref<3x256x128xf32, #tpu.memory_space<vmem>>, vector<1x256x128xf32>
    %78 = vector.shape_cast %77 : vector<1x256x128xf32> to vector<256x128xf32>
    %cst_66 = arith.constant dense<0.000000e+00> : vector<64x128xf32>
    %79 = tpu.matmul %76, %78, %cst_66 {dimension_numbers = #tpu.dot_dimension_numbers<[1], [0], [0], [1], [0, 0, 1, 1], [], []>} : vector<64x256xf32>, vector<256x128xf32>, vector<64x128xf32> -> vector<64x128xf32>
    %c0_67 = arith.constant 0 : index
    %c0_68 = arith.constant 0 : index
    %c0_69 = arith.constant 0 : index
    %80 = vector.load %arg13[%c0_67, %c0_68, %c0_69] : memref<3x1x128xf32, #tpu.memory_space<vmem>>, vector<1x1x128xf32>
    %81 = vector.shape_cast %80 : vector<1x1x128xf32> to vector<1x128xf32>
    %82 = vector.broadcast %81 : vector<1x128xf32> to vector<64x128xf32>
    %83 = arith.addf %79, %82 : vector<64x128xf32>
    %cst_70 = arith.constant 0.000000e+00 : f32
    %84 = vector.broadcast %cst_70 : f32 to vector<64x128xf32>
    %85 = arith.maximumf %83, %84 : vector<64x128xf32>
    %c1_71 = arith.constant 1 : index
    %c0_72 = arith.constant 0 : index
    %c0_73 = arith.constant 0 : index
    %86 = vector.load %arg3[%c1_71, %c0_72, %c0_73] : memref<3x64x64xbf16, #tpu.memory_space<vmem>>, vector<1x64x64xbf16>
    %87 = vector.shape_cast %86 : vector<1x64x64xbf16> to vector<64x64xbf16>
    %c1_74 = arith.constant 1 : index
    %c0_75 = arith.constant 0 : index
    %c0_76 = arith.constant 0 : index
    %88 = vector.load %arg5[%c1_74, %c0_75, %c0_76] : memref<3x64x1xf32, #tpu.memory_space<vmem>>, vector<1x64x1xf32>
    %89 = vector.shape_cast %88 : vector<1x64x1xf32> to vector<64x1xf32>
    %90 = arith.truncf %85 : vector<64x128xf32> to vector<64x128xbf16>
    %cst_77 = arith.constant dense<0.000000e+00> : vector<64x128xf32>
    %91 = tpu.matmul %87, %90, %cst_77 {dimension_numbers = #tpu.dot_dimension_numbers<[1], [0], [0], [1], [0, 0, 1, 1], [], []>} : vector<64x64xbf16>, vector<64x128xbf16>, vector<64x128xf32> -> vector<64x128xf32>
    %92 = vector.broadcast %89 : vector<64x1xf32> to vector<64x128xf32>
    %93 = arith.mulf %91, %92 : vector<64x128xf32>
    %94 = tpu.concatenate %85, %93 in 1 : vector<64x128xf32>, vector<64x128xf32> -> vector<64x256xf32>
    %c1_78 = arith.constant 1 : index
    %c0_79 = arith.constant 0 : index
    %c0_80 = arith.constant 0 : index
    %95 = vector.load %arg12[%c1_78, %c0_79, %c0_80] : memref<3x256x128xf32, #tpu.memory_space<vmem>>, vector<1x256x128xf32>
    %96 = vector.shape_cast %95 : vector<1x256x128xf32> to vector<256x128xf32>
    %cst_81 = arith.constant dense<0.000000e+00> : vector<64x128xf32>
    %97 = tpu.matmul %94, %96, %cst_81 {dimension_numbers = #tpu.dot_dimension_numbers<[1], [0], [0], [1], [0, 0, 1, 1], [], []>} : vector<64x256xf32>, vector<256x128xf32>, vector<64x128xf32> -> vector<64x128xf32>
    %c1_82 = arith.constant 1 : index
    %c0_83 = arith.constant 0 : index
    %c0_84 = arith.constant 0 : index
    %98 = vector.load %arg13[%c1_82, %c0_83, %c0_84] : memref<3x1x128xf32, #tpu.memory_space<vmem>>, vector<1x1x128xf32>
    %99 = vector.shape_cast %98 : vector<1x1x128xf32> to vector<1x128xf32>
    %100 = vector.broadcast %99 : vector<1x128xf32> to vector<64x128xf32>
    %101 = arith.addf %97, %100 : vector<64x128xf32>
    %cst_85 = arith.constant 0.000000e+00 : f32
    %102 = vector.broadcast %cst_85 : f32 to vector<64x128xf32>
    %103 = arith.maximumf %101, %102 : vector<64x128xf32>
    %c2_86 = arith.constant 2 : index
    %c0_87 = arith.constant 0 : index
    %c0_88 = arith.constant 0 : index
    %104 = vector.load %arg3[%c2_86, %c0_87, %c0_88] : memref<3x64x64xbf16, #tpu.memory_space<vmem>>, vector<1x64x64xbf16>
    %105 = vector.shape_cast %104 : vector<1x64x64xbf16> to vector<64x64xbf16>
    %c2_89 = arith.constant 2 : index
    %c0_90 = arith.constant 0 : index
    %c0_91 = arith.constant 0 : index
    %106 = vector.load %arg5[%c2_89, %c0_90, %c0_91] : memref<3x64x1xf32, #tpu.memory_space<vmem>>, vector<1x64x1xf32>
    %107 = vector.shape_cast %106 : vector<1x64x1xf32> to vector<64x1xf32>
    %108 = arith.truncf %103 : vector<64x128xf32> to vector<64x128xbf16>
    %cst_92 = arith.constant dense<0.000000e+00> : vector<64x128xf32>
    %109 = tpu.matmul %105, %108, %cst_92 {dimension_numbers = #tpu.dot_dimension_numbers<[1], [0], [0], [1], [0, 0, 1, 1], [], []>} : vector<64x64xbf16>, vector<64x128xbf16>, vector<64x128xf32> -> vector<64x128xf32>
    %110 = vector.broadcast %107 : vector<64x1xf32> to vector<64x128xf32>
    %111 = arith.mulf %109, %110 : vector<64x128xf32>
    %112 = tpu.concatenate %103, %111 in 1 : vector<64x128xf32>, vector<64x128xf32> -> vector<64x256xf32>
    %c2_93 = arith.constant 2 : index
    %c0_94 = arith.constant 0 : index
    %c0_95 = arith.constant 0 : index
    %113 = vector.load %arg12[%c2_93, %c0_94, %c0_95] : memref<3x256x128xf32, #tpu.memory_space<vmem>>, vector<1x256x128xf32>
    %114 = vector.shape_cast %113 : vector<1x256x128xf32> to vector<256x128xf32>
    %cst_96 = arith.constant dense<0.000000e+00> : vector<64x128xf32>
    %115 = tpu.matmul %112, %114, %cst_96 {dimension_numbers = #tpu.dot_dimension_numbers<[1], [0], [0], [1], [0, 0, 1, 1], [], []>} : vector<64x256xf32>, vector<256x128xf32>, vector<64x128xf32> -> vector<64x128xf32>
    %c2_97 = arith.constant 2 : index
    %c0_98 = arith.constant 0 : index
    %c0_99 = arith.constant 0 : index
    %116 = vector.load %arg13[%c2_97, %c0_98, %c0_99] : memref<3x1x128xf32, #tpu.memory_space<vmem>>, vector<1x1x128xf32>
    %117 = vector.shape_cast %116 : vector<1x1x128xf32> to vector<1x128xf32>
    %118 = vector.broadcast %117 : vector<1x128xf32> to vector<64x128xf32>
    %119 = arith.addf %115, %118 : vector<64x128xf32>
    %120 = tpu.concatenate %59, %119 in 1 : vector<64x128xf32>, vector<64x128xf32> -> vector<64x256xf32>
    %c0_100 = arith.constant 0 : index
    %c0_101 = arith.constant 0 : index
    %121 = vector.load %arg14[%c0_100, %c0_101] : memref<256x128xf32, #tpu.memory_space<vmem>>, vector<256x128xf32>
    %c0_102 = arith.constant 0 : index
    %c0_103 = arith.constant 0 : index
    %122 = vector.load %arg15[%c0_102, %c0_103] : memref<1x128xf32, #tpu.memory_space<vmem>>, vector<1x128xf32>
    %cst_104 = arith.constant 0.000000e+00 : f32
    %123 = vector.broadcast %cst_104 : f32 to vector<64x256xf32>
    %124 = arith.maximumf %120, %123 : vector<64x256xf32>
    %cst_105 = arith.constant dense<0.000000e+00> : vector<64x128xf32>
    %125 = tpu.matmul %124, %121, %cst_105 {dimension_numbers = #tpu.dot_dimension_numbers<[1], [0], [0], [1], [0, 0, 1, 1], [], []>} : vector<64x256xf32>, vector<256x128xf32>, vector<64x128xf32> -> vector<64x128xf32>
    %126 = vector.broadcast %122 : vector<1x128xf32> to vector<64x128xf32>
    %127 = arith.addf %125, %126 : vector<64x128xf32>
    %c0_106 = arith.constant 0 : index
    %c0_107 = arith.constant 0 : index
    %128 = vector.load %arg16[%c0_106, %c0_107] : memref<128x128xf32, #tpu.memory_space<vmem>>, vector<128x128xf32>
    %c0_108 = arith.constant 0 : index
    %c0_109 = arith.constant 0 : index
    %129 = vector.load %arg17[%c0_108, %c0_109] : memref<1x128xf32, #tpu.memory_space<vmem>>, vector<1x128xf32>
    %cst_110 = arith.constant dense<0.000000e+00> : vector<64x128xf32>
    %130 = tpu.matmul %127, %128, %cst_110 {dimension_numbers = #tpu.dot_dimension_numbers<[1], [0], [0], [1], [0, 0, 1, 1], [], []>} : vector<64x128xf32>, vector<128x128xf32>, vector<64x128xf32> -> vector<64x128xf32>
    %131 = vector.broadcast %129 : vector<1x128xf32> to vector<64x128xf32>
    %132 = arith.addf %130, %131 : vector<64x128xf32>
    %c0_111 = arith.constant 0 : index
    %c0_112 = arith.constant 0 : index
    %133 = vector.load %arg18[%c0_111, %c0_112] : memref<64x128xf32, #tpu.memory_space<vmem>>, vector<64x128xf32>
    tpu.vector_store %arg18[%c0_111, %c0_112], %132 {strides = array<i32>} : memref<64x128xf32, #tpu.memory_space<vmem>>, vector<64x128xf32>,
    return
  }
}

</mosaic_0001>

<bundles_post_ra>
// kernel: tpu_custom_call.1
= control target key start
LH: loop header
LB: loop body
LE: loop exit
PB: predicated region body
PF: predicated region fallthrough
CT: control target
= control target key end

     0   :  { %s5026_s0 = inlined_call_operand.hbm [shape: f32[64,128], index: 0, kind: input, shape index: {}]   ;;  %s5027_s1 = inlined_call_operand.hbm [shape: f32[64,128], index: 1, kind: input, shape index: {}]   ;;  %s5028_s2 = inlined_call_operand.hbm [shape: bf16[3,64,64], index: 2, kind: input, shape index: {}]   ;;  %s5029_s3 = inlined_call_operand.hbm [shape: bf16[3,64,64], index: 3, kind: input, shape index: {}]   ;;  %s5030_s4 = inlined_call_operand.vmem [shape: f32[3,64,1], index: 4, kind: input, shape index: {}]   ;;  %s5031_s5 = inlined_call_operand.vmem [shape: f32[3,64,1], index: 5, kind: input, shape index: {}]   ;;  %s5032_s6 = inlined_call_operand.vmem [shape: f32[128,128], index: 6, kind: input, shape index: {}]   ;;  %s5033_s7 = inlined_call_operand.vmem [shape: f32[1,128], index: 7, kind: input, shape index: {}]   ;;  %s5034_s8 = inlined_call_operand.hbm [shape: f32[3,256,128], index: 8, kind: input, shape index: {}]   ;;  %s5035_s9 = inlined_call_operand.vmem [shape: f32[3,1,128], index: 9, kind: input, shape index: {}]   ;;  %s5036_s10 = inlined_call_operand.hbm [shape: f32[128,128], index: 10, kind: input, shape index: {}]   ;;  %s5037_s11 = inlined_call_operand.vmem [shape: f32[1,128], index: 11, kind: input, shape index: {}]   ;;  %s5038_s12 = inlined_call_operand.hbm [shape: f32[3,256,128], index: 12, kind: input, shape index: {}]   ;;  %s5039_s13 = inlined_call_operand.vmem [shape: f32[3,1,128], index: 13, kind: input, shape index: {}]   ;;  %s5040_s14 = inlined_call_operand.vmem [shape: f32[256,128], index: 14, kind: input, shape index: {}]   ;;  %s5041_s15 = inlined_call_operand.vmem [shape: f32[1,128], index: 15, kind: input, shape index: {}]   ;;  %s5042_s16 = inlined_call_operand.hbm [shape: f32[128,128], index: 16, kind: input, shape index: {}]   ;;  %s5043_s17 = inlined_call_operand.vmem [shape: f32[1,128], index: 17, kind: input, shape index: {}]   ;;  %s5044_s18 = inlined_call_operand.hbm [shape: f32[64,128], index: 18, kind: output, shape index: {}]  }
   0x1   :  { %5050 = sst [smem:[#allocation23_spill]] %s5026_s0 }
   0x2   :  { %5051 = sst [smem:[#allocation24_spill]] %s5027_s1 }
   0x3   :  { %5052 = sst [smem:[#allocation25_spill]] %s5028_s2 }
   0x4   :  { %5053 = sst [smem:[#allocation26_spill]] %s5043_s17 }
   0x5   :  { %5054 = sst [smem:[#allocation27_spill]] %s5044_s18 }
   0x6   :  { %23 = vsyncpa [#allocation3], 0 }
   0x7   :  { %24 = vsyncpa [#allocation6], 0 }
   0x8   :  { %25 = vsyncpa [#allocation9], 0 }
   0x9   :  { %26 = vsyncpa [#allocation12], 0 }
   0xa   :  { %27 = vsyncpa [#allocation15], 0 }
   0xb   :  { %28 = vsyncpa [#allocation4], 0  ;;  %s4082_s27 = smov [#allocation5]   ;;  %s5055_s0 = sld [smem:[#allocation24_spill]] }
   0xc   :  { %s46_s28 = sshll.u32 %s4082_s27, 4  ;;  %s47_s28 = int_to_ptr.vmem [resolvable:$true] %s46_s28 }
  0x11   :  { %s3872_s19 = scalar_lea.hbm %s5055_s0, 1024 }
  0x12   :  { %p3873_p0 = scmp.ne.s32.totalorder %s5055_s0, %s3872_s19  ;;  %p3876_p1 = scmp.lt.u32.totalorder %s3872_s19, %s5055_s0 }
  0x14   :  { %p3878_p2 = pnand %p3876_p1, %p3873_p0 }
  0x16   :  { %3881 = shalt.err (!%p3878_p2)
}
  0x17   :  { %s3882_s2 = scalar_lea.vmem %s47_s28, 1024  ;;  %p3887_p4 = scmp.lt.s32.totalorder %s47_s28, %s47_s28 }
  0x18   :  { %p3883_p3 = scmp.ne.s32.totalorder %s47_s28, %s3882_s2  ;;  %p3888_p5 = scmp.lt.s32.totalorder %s3882_s2, %s3882_s2 }
  0x1a   :  { %p3889_p6 = por %p3888_p5, %p3887_p4 }
  0x1c   :  { %p3890_p7 = pnand %p3889_p6, %p3883_p3 }
  0x1e   :  { %3893 = shalt.err (!%p3890_p7)
}
  0x1f   :  { %s4083_s23 = smov 128   ;;  %s4084_s24 = smov 8  }
  0x20   :  { %52 = dma.hbm_to_vmem [thread:$0]  %s5055_s0, 1024, %s47_s28, [#allocation6], %s4083_s23, %s4083_s23, %s4084_s24  }
  0x21   :  { %s4085_s27 = smov [#allocation8]   ;;  %s4086_s30 = smov [#allocation11]  }
  0x22   :  { %s70_s29 = sshll.u32 %s4085_s27, 4  ;;  %s104_s19 = sshll.u32 %s4086_s30, 4  ;;  %s71_s29 = int_to_ptr.vmem [resolvable:$true] %s70_s29  ;;  %s105_s19 = int_to_ptr.vmem [resolvable:$true] %s104_s19 }
  0x23   :  { %s3894_s21 = scalar_lea.hbm %s5029_s3, 1536 }
  0x24   :  { %p3895_p8 = scmp.ne.s32.totalorder %s5029_s3, %s3894_s21  ;;  %p3898_p9 = scmp.lt.u32.totalorder %s3894_s21, %s5029_s3 }
  0x26   :  { %p3900_p10 = pnand %p3898_p9, %p3895_p8 }
  0x28   :  { %3903 = shalt.err (!%p3900_p10)
}
  0x29   :  { %s3904_s28 = scalar_lea.vmem %s71_s29, 1536  ;;  %p3909_p12 = scmp.lt.s32.totalorder %s71_s29, %s71_s29 }
  0x2a   :  { %p3905_p11 = scmp.ne.s32.totalorder %s71_s29, %s3904_s28  ;;  %p3910_p13 = scmp.lt.s32.totalorder %s3904_s28, %s3904_s28 }
  0x2c   :  { %p3911_p0 = por %p3910_p13, %p3909_p12 }
  0x2e   :  { %p3912_p1 = pnand %p3911_p0, %p3905_p11 }
  0x30   :  { %3915 = shalt.err (!%p3912_p1)
}
  0x31   :  { %s5049_s0 = smov 64   ;;  %s4088_s25 = smov 4  }
  0x32   :  { %76 = dma.hbm_to_vmem [thread:$0]  %s5029_s3, 1536, %s71_s29, [#allocation9], %s5049_s0, %s5049_s0, %s4088_s25  }
  0x33   :  { %s3916_s30 = scalar_lea.hbm %s5036_s10, 2048 }
  0x34   :  { %p3917_p2 = scmp.ne.s32.totalorder %s5036_s10, %s3916_s30  ;;  %p3920_p3 = scmp.lt.u32.totalorder %s3916_s30, %s5036_s10 }
  0x36   :  { %p3922_p4 = pnand %p3920_p3, %p3917_p2 }
  0x38   :  { %3925 = shalt.err (!%p3922_p4)
}
  0x39   :  { %s3926_s2 = scalar_lea.vmem %s105_s19, 2048  ;;  %p3931_p6 = scmp.lt.s32.totalorder %s105_s19, %s105_s19 }
  0x3a   :  { %p3927_p5 = scmp.ne.s32.totalorder %s105_s19, %s3926_s2  ;;  %p3932_p7 = scmp.lt.s32.totalorder %s3926_s2, %s3926_s2 }
  0x3c   :  { %p3933_p8 = por %p3932_p7, %p3931_p6 }
  0x3e   :  { %p3934_p9 = pnand %p3933_p8, %p3927_p5 }
  0x40   :  { %3937 = shalt.err (!%p3934_p9)
}
  0x41   :  { %110 = dma.hbm_to_vmem [thread:$0]  %s5036_s10, 2048, %s105_s19, [#allocation12], %s4083_s23, %s4083_s23, %s4084_s24  }
  0x42   :  { %s4089_s28 = smov [#allocation2]   ;;  %s4090_s27 = smov [#allocation7]  }
  0x43   :  { %s34_s26 = sshll.u32 %s4089_s28, 4  ;;  %s58_s17 = sshll.u32 %s4090_s27, 4  ;;  %s35_s26 = int_to_ptr.vmem [resolvable:$true] %s34_s26  ;;  %s59_s17 = int_to_ptr.vmem [resolvable:$true] %s58_s17 }
  0x44   :  { %s5056_s1 = sld [smem:[#allocation23_spill]] }
  0x4a   :  { %s3938_s20 = scalar_lea.hbm %s5056_s1, 1024 }
  0x4b   :  { %p3939_p10 = scmp.ne.s32.totalorder %s5056_s1, %s3938_s20  ;;  %p3942_p11 = scmp.lt.u32.totalorder %s3938_s20, %s5056_s1 }
  0x4d   :  { %p3944_p12 = pnand %p3942_p11, %p3939_p10 }
  0x4f   :  { %3947 = shalt.err (!%p3944_p12)
}
  0x50   :  { %s3948_s10 = scalar_lea.vmem %s35_s26, 1024  ;;  %p3953_p0 = scmp.lt.s32.totalorder %s35_s26, %s35_s26 }
  0x51   :  { %p3949_p13 = scmp.ne.s32.totalorder %s35_s26, %s3948_s10  ;;  %p3954_p1 = scmp.lt.s32.totalorder %s3948_s10, %s3948_s10 }
  0x53   :  { %p3955_p2 = por %p3954_p1, %p3953_p0 }
  0x55   :  { %p3956_p3 = pnand %p3955_p2, %p3949_p13 }
  0x57   :  { %3959 = shalt.err (!%p3956_p3)
}
  0x58   :  { %40 = dma.hbm_to_vmem [thread:$0]  %s5056_s1, 1024, %s35_s26, [#allocation3], %s4083_s23, %s4083_s23, %s4084_s24  }
  0x59   :  { %s5057_s28 = sld [smem:[#allocation25_spill]] }
  0x5f   :  { %s3960_s27 = scalar_lea.hbm %s5057_s28, 1536 }
  0x60   :  { %p3961_p4 = scmp.ne.s32.totalorder %s5057_s28, %s3960_s27  ;;  %p3964_p5 = scmp.lt.u32.totalorder %s3960_s27, %s5057_s28 }
  0x62   :  { %p3966_p6 = pnand %p3964_p5, %p3961_p4 }
  0x64   :  { %3969 = shalt.err (!%p3966_p6)
}
  0x65   :  { %s3970_s22 = scalar_lea.vmem %s59_s17, 1536  ;;  %p3975_p8 = scmp.lt.s32.totalorder %s59_s17, %s59_s17 }
  0x66   :  { %p3971_p7 = scmp.ne.s32.totalorder %s59_s17, %s3970_s22  ;;  %p3976_p9 = scmp.lt.s32.totalorder %s3970_s22, %s3970_s22 }
  0x68   :  { %p3977_p10 = por %p3976_p9, %p3975_p8 }
  0x6a   :  { %p3978_p11 = pnand %p3977_p10, %p3971_p7 }
  0x6c   :  { %3981 = shalt.err (!%p3978_p11)
}
  0x6d   :  { %s5058_s26 = smov 64   ;;  %s4091_s10 = smov [#allocation10]  }
  0x6e   :  { %64 = dma.hbm_to_vmem [thread:$0]  %s5057_s28, 1536, %s59_s17, [#allocation6], %s5058_s26, %s5058_s26, %s4088_s25  }
  0x6f   :  { %s90_s19 = sshll.u32 %s4091_s10, 4  ;;  %s4092_s3 = smov [#allocation13]   ;;  %s91_s19 = int_to_ptr.vmem [resolvable:$true] %s90_s19 }
  0x70   :  { %s118_s29 = sshll.u32 %s4092_s3, 4  ;;  %s3982_s18 = scalar_lea.hbm %s5034_s8, 12288  ;;  %s119_s29 = int_to_ptr.vmem [resolvable:$true] %s118_s29 }
  0x71   :  { %p3983_p12 = scmp.ne.s32.totalorder %s5034_s8, %s3982_s18  ;;  %p3986_p13 = scmp.lt.u32.totalorder %s3982_s18, %s5034_s8 }
  0x73   :  { %p3988_p0 = pnand %p3986_p13, %p3983_p12 }
  0x75   :  { %3991 = shalt.err (!%p3988_p0)
}
  0x76   :  { %s3992_s25 = scalar_lea.vmem %s91_s19, 12288  ;;  %p3997_p2 = scmp.lt.s32.totalorder %s91_s19, %s91_s19 }
  0x77   :  { %p3993_p1 = scmp.ne.s32.totalorder %s91_s19, %s3992_s25  ;;  %p3998_p3 = scmp.lt.s32.totalorder %s3992_s25, %s3992_s25 }
  0x79   :  { %p3999_p4 = por %p3998_p3, %p3997_p2 }
  0x7b   :  { %p4000_p5 = pnand %p3999_p4, %p3993_p1 }
  0x7d   :  { %4003 = shalt.err (!%p4000_p5)
}
  0x7e   :  { %96 = dma.hbm_to_vmem [thread:$0]  %s5034_s8, 12288, %s91_s19, [#allocation9], %s4083_s23, %s4083_s23, %s4084_s24  }
  0x7f   :  { %s4004_s2 = scalar_lea.hbm %s5038_s12, 12288 }
  0x80   :  { %p4005_p6 = scmp.ne.s32.totalorder %s5038_s12, %s4004_s2  ;;  %p4008_p7 = scmp.lt.u32.totalorder %s4004_s2, %s5038_s12 }
  0x82   :  { %p4010_p8 = pnand %p4008_p7, %p4005_p6 }
  0x84   :  { %4013 = shalt.err (!%p4010_p8)
}
  0x85   :  { %s4014_s18 = scalar_lea.vmem %s119_s29, 12288  ;;  %p4019_p10 = scmp.lt.s32.totalorder %s119_s29, %s119_s29 }
  0x86   :  { %p4015_p9 = scmp.ne.s32.totalorder %s119_s29, %s4014_s18  ;;  %p4020_p11 = scmp.lt.s32.totalorder %s4014_s18, %s4014_s18 }
  0x88   :  { %p4021_p12 = por %p4020_p11, %p4019_p10 }
  0x8a   :  { %p4022_p13 = pnand %p4021_p12, %p4015_p9 }
  0x8c   :  { %4025 = shalt.err (!%p4022_p13)
}
  0x8d   :  { %124 = dma.hbm_to_vmem [thread:$0]  %s5038_s12, 12288, %s119_s29, [#allocation12], %s4083_s23, %s4083_s23, %s4084_s24  }
  0x8e   :  { %s4093_s30 = smov [#allocation14]   ;;  %s4026_s25 = scalar_lea.hbm %s5042_s16, 2048 }
  0x8f   :  { %s136_s20 = sshll.u32 %s4093_s30, 4  ;;  %p4027_p0 = scmp.ne.s32.totalorder %s5042_s16, %s4026_s25  ;;  %s137_s20 = int_to_ptr.vmem [resolvable:$true] %s136_s20 }
  0x90   :  { %p4030_p1 = scmp.lt.u32.totalorder %s4026_s25, %s5042_s16 }
  0x92   :  { %p4032_p2 = pnand %p4030_p1, %p4027_p0 }
  0x94   :  { %4035 = shalt.err (!%p4032_p2)
}
  0x95   :  { %s4036_s2 = scalar_lea.vmem %s137_s20, 2048  ;;  %p4041_p4 = scmp.lt.s32.totalorder %s137_s20, %s137_s20 }
  0x96   :  { %p4037_p3 = scmp.ne.s32.totalorder %s137_s20, %s4036_s2  ;;  %p4042_p5 = scmp.lt.s32.totalorder %s4036_s2, %s4036_s2 }
  0x98   :  { %p4043_p6 = por %p4042_p5, %p4041_p4 }
  0x9a   :  { %p4044_p7 = pnand %p4043_p6, %p4037_p3 }
  0x9c   :  { %4047 = shalt.err (!%p4044_p7)
}
  0x9d   :  { %142 = dma.hbm_to_vmem [thread:$0]  %s5042_s16, 2048, %s137_s20, [#allocation15], %s4083_s23, %s4083_s23, %s4084_s24  }
  0x9e   :  { %4070 = dma.done.wait [#allocation3], 1024  }
  0x9f   :  { %4071 = vsyncadd [#allocation3], 4294966272 }
  0xa0   :  { %4072 = dma.done.wait [#allocation6], 2560  }
  0xa1   :  { %4073 = vsyncadd [#allocation6], 4294964736 }
  0xa2   :  { %4074 = dma.done.wait [#allocation9], 13824  }
  0xa3   :  { %4075 = vsyncadd [#allocation9], 4294953472 }
  0xa4   :  { %4076 = dma.done.wait [#allocation12], 14336  }
  0xa5   :  { %4077 = vsyncadd [#allocation12], 4294952960 }
  0xa6   :  { %4078 = dma.done.wait [#allocation15], 2048  }
  0xa7   :  { %4079 = vsyncadd [#allocation15], 4294965248  ;;  %v178_v0 = vld [vmem:[%s5032_s6] sm:$0xff]  ;;  %v179_v1 = vld [vmem:[%s5032_s6 + $0x8] sm:$0xff]  ;;  %v4094_v32 = vmov 0   ;;  %vm354_vm0 = vcmask 523264  }
  0xa8   :  { %v180_v2 = vld [vmem:[%s5032_s6 + $0x10] sm:$0xff]  ;;  %v3512_v3 = vpack.c.bf16 %v179_v1, %v178_v0  ;;  %v181_v4 = vld [vmem:[%s5032_s6 + $0x18] sm:$0xff]  ;;  %v182_v6 = vld [vmem:[%s5032_s6 + $0x20] sm:$0xff]  ;;  %3846 = vset.pattern.permute.xlu0 %v4094_v32  ;;  %3847 = vset.pattern.permute.xlu1 %v4094_v32  ;;  %s5059_s18 = sld [smem:[#allocation26_spill]]  ;;  %s4095_s16 = smov [#allocation16]  }
  0xa9   :  { %v3516_v5 = vpack.c.bf16 %v181_v4, %v180_v2  ;;  %v183_v7 = vld [vmem:[%s5032_s6 + $0x28] sm:$0xff]  ;;  %v170_v9 = vld [vmem:[#allocation2] sm:$0xff]  ;;  %v184_v10 = vld [vmem:[%s5032_s6 + $0x30] sm:$0xff]  ;;  %s2662_s8 = sshll.u32 %s4095_s16, 4  ;;  %s2663_s8 = int_to_ptr.vmem [resolvable:$true] %s2662_s8 }
  0xaa   :  { %3513 = vmatprep.subr.bf16.mxu0 %v3512_v3  ;;  %v3520_v8 = vpack.c.bf16 %v183_v7, %v182_v6  ;;  %v185_v11 = vld [vmem:[%s5032_s6 + $0x38] sm:$0xff]  ;;  %3316 = vmatprep.mubr.f32.mxu0 %v170_v9  ;;  %v186_v12 = vld [vmem:[%s5032_s6 + $0x40] sm:$0xff]  ;;  %v187_v13 = vld [vmem:[%s5032_s6 + $0x48] sm:$0xff]  ;;  %p4053_p9 = scmp.lt.s32.totalorder %s2663_s8, %s2663_s8 }
  0xab   :  { %3515 = vmatpush3.bf16.msra.mxu0 %v3512_v3  ;;  %v3524_v14 = vpack.c.bf16 %v185_v11, %v184_v10  ;;  %v188_v15 = vld [vmem:[%s5032_s6 + $0x50] sm:$0xff]  ;;  %v189_v16 = vld [vmem:[%s5032_s6 + $0x58] sm:$0xff]  ;;  %v3528_v17 = vpack.c.bf16 %v187_v13, %v186_v12  ;;  %v190_v18 = vld [vmem:[%s5032_s6 + $0x60] sm:$0xff] }
  0xac   :  { %3517 = vmatprep.subr.bf16.mxu0 %v3516_v5  ;;  %v191_v19 = vld [vmem:[%s5032_s6 + $0x68] sm:$0xff]  ;;  %v3532_v20 = vpack.c.bf16 %v189_v16, %v188_v15  ;;  %v192_v21 = vld [vmem:[%s5032_s6 + $0x70] sm:$0xff]  ;;  %v193_v22 = vld [vmem:[%s5032_s6 + $0x78] sm:$0xff] }
  0xad   :  { %v3536_v23 = vpack.c.bf16 %v191_v19, %v190_v18  ;;  %v3540_v24 = vpack.c.bf16 %v193_v22, %v192_v21  ;;  %v171_v25 = vld [vmem:[#allocation2 + $0x8] sm:$0xff]  ;;  %v172_v26 = vld [vmem:[#allocation2 + $0x10] sm:$0xff]  ;;  %v173_v27 = vld [vmem:[#allocation2 + $0x18] sm:$0xff] }
  0xae   :  { %v174_v28 = vld [vmem:[#allocation2 + $0x20] sm:$0xff]  ;;  %v175_v29 = vld [vmem:[#allocation2 + $0x28] sm:$0xff]  ;;  %v176_v30 = vld [vmem:[#allocation2 + $0x30] sm:$0xff] }
  0xaf   :  { %3519 = vmatpush3.bf16.msra.mxu0 %v3516_v5  ;;  %v177_v31 = vld [vmem:[#allocation2 + $0x38] sm:$0xff]  ;;  %v322_v33 = vld [vmem:[%s5030_s4] sm:$0xff]  ;;  %v323_v34 = vld [vmem:[%s5030_s4 + $0x8] sm:$0xff] }
  0xb0   :  { %3521 = vmatprep.subr.bf16.mxu0 %v3520_v8  ;;  %434 = vperm.xlu0 %3846, %v322_v33   ;;  %v3848_v35 = vld [vmem:[#allocation7] sm:$0xff]   ;;  %v324_v36 = vld [vmem:[%s5030_s4 + $0x10] sm:$0xff]  ;;  %v325_v38 = vld [vmem:[%s5030_s4 + $0x18] sm:$0xff] }
  0xb1   :  { %3336 = vmatprep.mubr.msk.bf16.mxu1 %vm354_vm0, %v3848_v35  ;;  %v326_v37 = vld [vmem:[%s5030_s4 + $0x20] sm:$0xff]  ;;  %444 = vperm.xlu1 %3847, %v324_v36   ;;  %v328_v39 = vld [vmem:[%s5030_s4 + $0x30] sm:$0xff]  ;;  %v327_v40 = vld [vmem:[%s5030_s4 + $0x28] sm:$0xff] }
  0xb2   :  { %v2688_v41 = vld [vmem:[%s5030_s4 + $0x40] sm:$0xff]  ;;  %v329_v42 = vld [vmem:[%s5030_s4 + $0x38] sm:$0xff]  ;;  %v2690_v43 = vld [vmem:[%s5030_s4 + $0x50] sm:$0xff] }
  0xb3   :  { %3523 = vmatpush3.bf16.msra.mxu0 %v3520_v8  ;;  %v2689_v44 = vld [vmem:[%s5030_s4 + $0x48] sm:$0xff]  ;;  %v2692_v45 = vld [vmem:[%s5030_s4 + $0x60] sm:$0xff]  ;;  %v2691_v46 = vld [vmem:[%s5030_s4 + $0x58] sm:$0xff] }
  0xb4   :  { %3525 = vmatprep.subr.bf16.mxu0 %v3524_v14  ;;  %439 = vperm.xlu0 %3846, %v323_v34   ;;  %v2694_v47 = vld [vmem:[%s5030_s4 + $0x70] sm:$0xff]  ;;  %v2693_v48 = vld [vmem:[%s5030_s4 + $0x68] sm:$0xff]  ;;  %v2706_v49 = vld [vmem:[%s5030_s4 + $0x80] sm:$0xff] }
  0xb5   :  { %449 = vperm.xlu1 %3847, %v325_v38   ;;  %v2695_v50 = vld [vmem:[%s5030_s4 + $0x78] sm:$0xff]  ;;  %v2708_v51 = vld [vmem:[%s5030_s4 + $0x90] sm:$0xff]  ;;  %v2707_v52 = vld [vmem:[%s5030_s4 + $0x88] sm:$0xff] }
  0xb6   :  { %v2710_v53 = vld [vmem:[%s5030_s4 + $0xa0] sm:$0xff]  ;;  %v2709_v54 = vld [vmem:[%s5030_s4 + $0x98] sm:$0xff]  ;;  %v2712_v55 = vld [vmem:[%s5030_s4 + $0xb0] sm:$0xff] }
  0xb7   :  { %3527 = vmatpush3.bf16.msra.mxu0 %v3524_v14  ;;  %v2711_v56 = vld [vmem:[%s5030_s4 + $0xa8] sm:$0xff]  ;;  %v1418_v57 = vld [vmem:[%s5031_s5] sm:$0xff]  ;;  %v2713_v58 = vld [vmem:[%s5030_s4 + $0xb8] sm:$0xff] }
  0xb8   :  { %3529 = vmatprep.subr.bf16.mxu0 %v3528_v17  ;;  %454 = vperm.xlu0 %3846, %v326_v37   ;;  %v1420_v59 = vld [vmem:[%s5031_s5 + $0x10] sm:$0xff]  ;;  %v1419_v60 = vld [vmem:[%s5031_s5 + $0x8] sm:$0xff]  ;;  %v1422_v61 = vld [vmem:[%s5031_s5 + $0x20] sm:$0xff] }
  0xb9   :  { %459 = vperm.xlu1 %3847, %v327_v40   ;;  %v1421_v62 = vld [vmem:[%s5031_s5 + $0x18] sm:$0xff]  ;;  %v1424_v63 = vld [vmem:[%s5031_s5 + $0x30] sm:$0xff]  ;;  %v1423_v0 = vld [vmem:[%s5031_s5 + $0x28] sm:$0xff] }
  0xba   :  { %v2734_v1 = vld [vmem:[%s5031_s5 + $0x40] sm:$0xff]  ;;  %v1425_v2 = vld [vmem:[%s5031_s5 + $0x38] sm:$0xff]  ;;  %v2736_v3 = vld [vmem:[%s5031_s5 + $0x50] sm:$0xff] }
  0xbb   :  { %3531 = vmatpush3.bf16.msra.mxu0 %v3528_v17  ;;  %v2735_v4 = vld [vmem:[%s5031_s5 + $0x48] sm:$0xff]  ;;  %v2738_v5 = vld [vmem:[%s5031_s5 + $0x60] sm:$0xff]  ;;  %v2737_v6 = vld [vmem:[%s5031_s5 + $0x58] sm:$0xff] }
  0xbc   :  { %3533 = vmatprep.subr.bf16.mxu0 %v3532_v20  ;;  %464 = vperm.xlu0 %3846, %v328_v39   ;;  %v2740_v7 = vld [vmem:[%s5031_s5 + $0x70] sm:$0xff]  ;;  %v2739_v8 = vld [vmem:[%s5031_s5 + $0x68] sm:$0xff]  ;;  %v2752_v9 = vld [vmem:[%s5031_s5 + $0x80] sm:$0xff] }
  0xbd   :  { %469 = vperm.xlu1 %3847, %v329_v42   ;;  %v2741_v10 = vld [vmem:[%s5031_s5 + $0x78] sm:$0xff]  ;;  %v2754_v11 = vld [vmem:[%s5031_s5 + $0x90] sm:$0xff]  ;;  %v2753_v12 = vld [vmem:[%s5031_s5 + $0x88] sm:$0xff] }
  0xbe   :  { %v2756_v13 = vld [vmem:[%s5031_s5 + $0xa0] sm:$0xff]  ;;  %v2755_v14 = vld [vmem:[%s5031_s5 + $0x98] sm:$0xff]  ;;  %v2758_v15 = vld [vmem:[%s5031_s5 + $0xb0] sm:$0xff] }
  0xbf   :  { %3535 = vmatpush3.bf16.msra.mxu0 %v3532_v20  ;;  %v2757_v16 = vld [vmem:[%s5031_s5 + $0xa8] sm:$0xff]  ;;  %v2759_v17 = vld [vmem:[%s5031_s5 + $0xb8] sm:$0xff]  ;;  %v2678_v18 = vld [vmem:[%s5033_s7] ss:$0 sm:$0xff] }
  0xc0   :  { %3537 = vmatprep.subr.bf16.mxu0 %v3536_v23  ;;  %753 = vperm.xlu0 %3846, %v2688_v41  }
  0xc1   :  { %758 = vperm.xlu1 %3847, %v2689_v44  }
  0xc3   :  { %3539 = vmatpush3.bf16.msra.mxu0 %v3536_v23 }
  0xc4   :  { %3541 = vmatprep.subr.bf16.mxu0 %v3540_v24  ;;  %763 = vperm.xlu0 %3846, %v2690_v43  }
  0xc5   :  { %768 = vperm.xlu1 %3847, %v2691_v46   ;;  %v497_v46 = vld [vmem:[#allocation10 + $0x88] sm:$0xff] }
  0xc7   :  { %3543 = vmatpush3.bf16.msra.mxu0 %v3540_v24 }
  0xc8   :  { %773 = vperm.xlu0 %3846, %v2692_v45   ;;  %v496_v45 = vld [vmem:[#allocation10 + $0x80] sm:$0xff] }
  0xc9   :  { %778 = vperm.xlu1 %3847, %v2693_v48  }
  0xca   :  { %3317 = vmatmul.mubr.f32.vlgmr.msra.gmra.mrb[0].mxu0 %v171_v25 }
  0xcb   :  { %3319 = vmatprep.mubr.f32.mxu0 %v172_v26 }
  0xcc   :  { %783 = vperm.xlu0 %3846, %v2694_v47  }
  0xcd   :  { %788 = vperm.xlu1 %3847, %v2695_v50   ;;  %v480_v50 = vld [vmem:[#allocation10] sm:$0xff] }
  0xce   :  { %3320 = vmatmul.mubr.f32.gmra.mrb[2].mxu0 %v173_v27 }
  0xcf   :  { %3322 = vmatprep.mubr.f32.mxu0 %v174_v28 }
  0xd0   :  { %1074 = vperm.xlu0 %3846, %v2706_v49   ;;  %v3544_v49 = vpack.c.bf16 %v497_v46, %v496_v45  ;;  %v494_v46 = vld [vmem:[#allocation10 + $0x70] sm:$0xff] }
  0xd1   :  { %1079 = vperm.xlu1 %3847, %v2707_v52   ;;  %v498_v52 = vld [vmem:[#allocation10 + $0x90] sm:$0xff] }
  0xd2   :  { %3323 = vmatmul.mubr.f32.gmra.mrb[4].mxu0 %v175_v29 }
  0xd3   :  { %3325 = vmatprep.mubr.f32.mxu0 %v176_v30 }
  0xd4   :  { %1084 = vperm.xlu0 %3846, %v2708_v51   ;;  %v481_v51 = vld [vmem:[#allocation10 + $0x8] sm:$0xff] }
  0xd5   :  { %1089 = vperm.xlu1 %3847, %v2709_v54   ;;  %v3849_v54 = vld [vmem:[#allocation7 + $0x8] sm:$0xff]  }
  0xd6   :  { %3326 = vmatmul.mubr.f32.gmra.mrb[6].mxu0 %v177_v31 }
  0xd8   :  { %1094 = vperm.xlu0 %3846, %v2710_v53   ;;  %v499_v53 = vld [vmem:[#allocation10 + $0x98] sm:$0xff] }
  0xd9   :  { %1099 = vperm.xlu1 %3847, %v2711_v56   ;;  %v3546_v56 = vpack.c.bf16 %v481_v51, %v480_v50 }
  0xdc   :  { %1104 = vperm.xlu0 %3846, %v2712_v55   ;;  %v3850_v55 = vld [vmem:[#allocation7 + $0x10] sm:$0xff]  }
  0xdd   :  { %1109 = vperm.xlu1 %3847, %v2713_v58   ;;  %v482_v58 = vld [vmem:[#allocation10 + $0x10] sm:$0xff] }
  0xe0   :  { %1529 = vperm.xlu0 %3846, %v1418_v57   ;;  %v3548_v57 = vpack.c.bf16 %v499_v53, %v498_v52 }
  0xe1   :  { %1534 = vperm.xlu1 %3847, %v1419_v60   ;;  %v500_v60 = vld [vmem:[#allocation10 + $0xa0] sm:$0xff] }
  0xe4   :  { %1539 = vperm.xlu0 %3846, %v1420_v59   ;;  %v483_v59 = vld [vmem:[#allocation10 + $0x18] sm:$0xff] }
  0xe5   :  { %1544 = vperm.xlu1 %3847, %v1421_v62   ;;  %v3550_v62 = vpack.c.bf16 %v483_v59, %v482_v58 }
  0xe8   :  { %1549 = vperm.xlu0 %3846, %v1422_v61   ;;  %v501_v61 = vld [vmem:[#allocation10 + $0xa8] sm:$0xff] }
  0xe9   :  { %1554 = vperm.xlu1 %3847, %v1423_v0   ;;  %v484_v0 = vld [vmem:[#allocation10 + $0x20] sm:$0xff] }
  0xec   :  { %1559 = vperm.xlu0 %3846, %v1424_v63   ;;  %v3552_v63 = vpack.c.bf16 %v501_v61, %v500_v60 }
  0xed   :  { %1564 = vperm.xlu1 %3847, %v1425_v2   ;;  %v502_v2 = vld [vmem:[#allocation10 + $0xb0] sm:$0xff] }
  0xf0   :  { %1848 = vperm.xlu0 %3846, %v2734_v1   ;;  %v485_v1 = vld [vmem:[#allocation10 + $0x28] sm:$0xff] }
  0xf1   :  { %1853 = vperm.xlu1 %3847, %v2735_v4   ;;  %v3851_v4 = vld [vmem:[#allocation7 + $0x18] sm:$0xff]  }
  0xf4   :  { %1858 = vperm.xlu0 %3846, %v2736_v3   ;;  %v503_v3 = vld [vmem:[#allocation10 + $0xb8] sm:$0xff] }
  0xf5   :  { %1863 = vperm.xlu1 %3847, %v2737_v6   ;;  %v3556_v6 = vpack.c.bf16 %v503_v3, %v502_v2 }
  0xf8   :  { %1868 = vperm.xlu0 %3846, %v2738_v5   ;;  %v3554_v5 = vpack.c.bf16 %v485_v1, %v484_v0 }
  0xf9   :  { %1873 = vperm.xlu1 %3847, %v2739_v8   ;;  %v487_v8 = vld [vmem:[#allocation10 + $0x38] sm:$0xff] }
  0xfc   :  { %1878 = vperm.xlu0 %3846, %v2740_v7   ;;  %v486_v7 = vld [vmem:[#allocation10 + $0x30] sm:$0xff] }
  0xfd   :  { %1883 = vperm.xlu1 %3847, %v2741_v10   ;;  %v505_v10 = vld [vmem:[#allocation10 + $0xc8] sm:$0xff] }
 0x100   :  { %2169 = vperm.xlu0 %3846, %v2752_v9   ;;  %v504_v9 = vld [vmem:[#allocation10 + $0xc0] sm:$0xff] }
 0x101   :  { %2174 = vperm.xlu1 %3847, %v2753_v12   ;;  %v3560_v12 = vpack.c.bf16 %v505_v10, %v504_v9 }
 0x104   :  { %2179 = vperm.xlu0 %3846, %v2754_v11   ;;  %v3558_v11 = vpack.c.bf16 %v487_v8, %v486_v7 }
 0x105   :  { %2184 = vperm.xlu1 %3847, %v2755_v14   ;;  %v489_v14 = vld [vmem:[#allocation10 + $0x48] sm:$0xff] }
 0x108   :  { %2189 = vperm.xlu0 %3846, %v2756_v13   ;;  %v488_v13 = vld [vmem:[#allocation10 + $0x40] sm:$0xff] }
 0x109   :  { %2194 = vperm.xlu1 %3847, %v2757_v16   ;;  %v507_v16 = vld [vmem:[#allocation10 + $0xd8] sm:$0xff] }
 0x10c   :  { %2199 = vperm.xlu0 %3846, %v2758_v15   ;;  %v506_v15 = vld [vmem:[#allocation10 + $0xd0] sm:$0xff] }
 0x10d   :  { %2204 = vperm.xlu1 %3847, %v2759_v17   ;;  %v3562_v17 = vpack.c.bf16 %v489_v14, %v488_v13 }
 0x12f   :  { %v435_v50 = vpop.permute.xlu0 %434 }
 0x130   :  { %v445_v58 = vpop.permute.xlu1 %444 }
 0x19d   :  { %v3318_v19 = vpop.f32.mrb[0].mxu0 }
 0x19e   :  { %v4507_v20 = vadd.f32 %v3318_v19, %v2678_v18  ;;  %v267_v21 = vpop.f32.mrb[1].mxu0  ;;  %v490_v19 = vld [vmem:[#allocation10 + $0x50] sm:$0xff] }
 0x19f   :  { %v4509_v22 = vadd.f32 %v2678_v18, %v267_v21  ;;  %v491_v21 = vld [vmem:[#allocation10 + $0x58] sm:$0xff] }
 0x1a0   :  { %v307_v23 = vmax.f32 %v4507_v20, 0.0 }
 0x1a1   :  { %v306_v24 = vmax.f32 %v4509_v22, 0.0  ;;  %v3321_v25 = vpop.f32.mrb[2].mxu0 }
 0x1a2   :  { %v4513_v26 = vadd.f32 %v3321_v25, %v2678_v18  ;;  %v277_v27 = vpop.f32.mrb[3].mxu0  ;;  %v508_v25 = vld [vmem:[#allocation10 + $0xe0] sm:$0xff] }
 0x1a3   :  { %v4515_v28 = vadd.f32 %v2678_v18, %v277_v27  ;;  %v330_v29 = vpack.c.bf16 %v307_v23, %v306_v24  ;;  %v509_v27 = vld [vmem:[#allocation10 + $0xe8] sm:$0xff] }
 0x1a4   :  { %v309_v30 = vmax.f32 %v4513_v26, 0.0  ;;  %v3852_v26 = vld [vmem:[#allocation7 + $0x20] sm:$0xff]  }
 0x1a5   :  { %v308_v31 = vmax.f32 %v4515_v28, 0.0  ;;  %v3324_v32 = vpop.f32.mrb[4].mxu0  ;;  %3328 = vmatprep.subr.bf16.mxu1 %v330_v29  ;;  %3352 = vmatprep.mubr.msk.bf16.mxu0 %vm354_vm0, %v3852_v26  ;;  %v805_v26 = vld [vmem:[#allocation10 + $0x128] sm:$0xff] }
 0x1a6   :  { %v4523_v33 = vadd.f32 %v3324_v32, %v2678_v18  ;;  %v287_v34 = vpop.f32.mrb[5].mxu0  ;;  %3329 = vmatpush3.bf16.msra.mxu1 %v330_v29  ;;  %v3566_v29 = vpack.c.bf16 %v491_v21, %v490_v19  ;;  %v3568_v32 = vpack.c.bf16 %v509_v27, %v508_v25 }
 0x1a7   :  { %v331_v35 = vpack.c.bf16 %v309_v30, %v308_v31  ;;  %v4529_v36 = vadd.f32 %v2678_v18, %v287_v34  ;;  %v492_v34 = vld [vmem:[#allocation10 + $0x60] sm:$0xff] }
 0x1a8   :  { %v311_v37 = vmax.f32 %v4523_v33, 0.0  ;;  %v2687_v33 = vld [vmem:[%s5035_s9] ss:$0 sm:$0xff] }
 0x1a9   :  { %v310_v38 = vmax.f32 %v4529_v36, 0.0  ;;  %v3327_v39 = vpop.f32.mrb[6].mxu0  ;;  %3330 = vmatprep.subr.bf16.mxu1 %v331_v35 }
 0x1aa   :  { %v4533_v40 = vadd.f32 %v3327_v39, %v2678_v18  ;;  %v297_v41 = vpop.f32.mrb[7].mxu0  ;;  %3331 = vmatpush3.bf16.msra.mxu1 %v331_v35  ;;  %v493_v35 = vld [vmem:[#allocation10 + $0x68] sm:$0xff] }
 0x1ab   :  { %v332_v42 = vpack.c.bf16 %v311_v37, %v310_v38  ;;  %v4539_v43 = vadd.f32 %v2678_v18, %v297_v41  ;;  %v3564_v18 = vpack.c.bf16 %v507_v16, %v506_v15  ;;  %v3570_v39 = vpack.c.bf16 %v493_v35, %v492_v34  ;;  %v510_v41 = vld [vmem:[#allocation10 + $0xf0] sm:$0xff] }
 0x1ac   :  { %v313_v44 = vmax.f32 %v4533_v40, 0.0 }
 0x1ad   :  { %v312_v47 = vmax.f32 %v4539_v43, 0.0  ;;  %3332 = vmatprep.subr.bf16.mxu1 %v332_v42 }
 0x1ae   :  { %3333 = vmatpush3.bf16.msra.mxu1 %v332_v42  ;;  %v511_v42 = vld [vmem:[#allocation10 + $0xf8] sm:$0xff] }
 0x1af   :  { %v333_v48 = vpack.c.bf16 %v313_v44, %v312_v47  ;;  %v3572_v45 = vpack.c.bf16 %v511_v42, %v510_v41 }
 0x1b1   :  { %3334 = vmatprep.subr.bf16.mxu1 %v333_v48 }
 0x1b2   :  { %3335 = vmatpush3.bf16.msra.mxu1 %v333_v48  ;;  %v495_v48 = vld [vmem:[#allocation10 + $0x78] sm:$0xff] }
 0x1b3   :  { %3545 = vmatprep.subr.bf16.mxu1 %v3544_v49  ;;  %v3574_v49 = vpack.c.bf16 %v495_v48, %v494_v46 }
 0x1b5   :  { %3337 = vmatmul.mubr.msk.bf16.vlgmr.msra.gmra.mrb[0].mxu1 %vm354_vm0, %v3849_v54 }
 0x1b6   :  { %3340 = vmatprep.mubr.msk.bf16.mxu1 %vm354_vm0, %v3850_v55  ;;  %3547 = vmatpush3.bf16.msra.mxu1 %v3546_v56  ;;  %v440_v55 = vpop.permute.xlu0 %439 }
 0x1b7   :  { %3549 = vmatprep.subr.bf16.mxu1 %v3548_v57 }
 0x1ba   :  { %3551 = vmatpush3.bf16.msra.mxu1 %v3550_v62  ;;  %v455_v2 = vpop.permute.xlu0 %454 }
 0x1bb   :  { %3553 = vmatprep.subr.bf16.mxu1 %v3552_v63  ;;  %v450_v63 = vpop.permute.xlu1 %449 }
 0x1bd   :  { %3341 = vmatmul.mubr.msk.bf16.gmra.mrb[4].mxu1 %vm354_vm0, %v3851_v4 }
 0x1be   :  { %3555 = vmatpush3.bf16.msra.mxu1 %v3554_v5  ;;  %v465_v20 = vpop.permute.xlu0 %464 }
 0x1bf   :  { %3557 = vmatprep.subr.bf16.mxu1 %v3556_v6  ;;  %v460_v22 = vpop.permute.xlu1 %459 }
 0x1c2   :  { %3559 = vmatpush3.bf16.msra.mxu1 %v3558_v11 }
 0x1c3   :  { %3561 = vmatprep.subr.bf16.mxu1 %v3560_v12  ;;  %v470_v28 = vpop.permute.xlu1 %469 }
 0x1c6   :  { %3563 = vmatpush3.bf16.msra.mxu1 %v3562_v17 }
 0x1c7   :  { %3565 = vmatprep.subr.bf16.mxu1 %v3564_v18 }
 0x1ca   :  { %3567 = vmatpush3.bf16.msra.mxu1 %v3566_v29 }
 0x1cb   :  { %3569 = vmatprep.subr.bf16.mxu1 %v3568_v32 }
 0x1ce   :  { %3571 = vmatpush3.bf16.msra.mxu1 %v3570_v39 }
 0x1cf   :  { %3573 = vmatprep.subr.bf16.mxu1 %v3572_v45 }
 0x1d2   :  { %3575 = vmatpush3.bf16.msra.mxu1 %v3574_v49 }
 0x288   :  { %v3338_v51 = vpop.f32.mrb[0].mxu1 }
 0x289   :  { %v401_v52 = vpop.f32.mrb[1].mxu1  ;;  %v474_v59 = vmul.f32 %v3338_v51, %v445_v58 }
 0x28a   :  { %v472_v53 = vmul.f32 %v435_v50, %v401_v52  ;;  %v3339_v54 = vpop.f32.mrb[2].mxu1 }
 0x28b   :  { %v404_v56 = vpop.f32.mrb[3].mxu1  ;;  %v475_v1 = vmul.f32 %v3339_v54, %v450_v63  ;;  %v817_v54 = vld [vmem:[#allocation10 + $0x188] sm:$0xff] }
 0x28c   :  { %v473_v57 = vmul.f32 %v440_v55, %v404_v56  ;;  %583 = vmatprep.mubr.f32.mxu1 %v472_v53  ;;  %v816_v53 = vld [vmem:[#allocation10 + $0x180] sm:$0xff]  ;;  %v3853_v63 = vld [vmem:[#allocation7 + $0x28] sm:$0xff]  }
 0x28d   :  { %584 = vmatmul.mubr.f32.vlgmr.msra.gmra.mrb[8].mxu1 %v306_v24  ;;  %v3576_v58 = vpack.c.bf16 %v817_v54, %v816_v53  ;;  %v814_v54 = vld [vmem:[#allocation10 + $0x170] sm:$0xff] }
 0x28e   :  { %588 = vmatprep.mubr.f32.mxu1 %v473_v57 }
 0x290   :  { %v3342_v60 = vpop.f32.mrb[4].mxu1 }
 0x291   :  { %v417_v61 = vpop.f32.mrb[5].mxu1  ;;  %589 = vmatmul.mubr.f32.gmra.mrb[10].mxu1 %v307_v23  ;;  %v478_v23 = vmul.f32 %v3342_v60, %v465_v20  ;;  %v801_v60 = vld [vmem:[#allocation10 + $0x108] sm:$0xff] }
 0x292   :  { %v3343_v62 = vpop.f32.mrb[6].mxu1  ;;  %593 = vmatprep.mubr.f32.mxu1 %v474_v59  ;;  %v476_v3 = vmul.f32 %v455_v2, %v417_v61  ;;  %v800_v59 = vld [vmem:[#allocation10 + $0x100] sm:$0xff]  ;;  %v818_v61 = vld [vmem:[#allocation10 + $0x190] sm:$0xff]  ;;  %v821_v20 = vld [vmem:[#allocation10 + $0x1a8] sm:$0xff] }
 0x293   :  { %v420_v0 = vpop.f32.mrb[7].mxu1 }
 0x294   :  { %v477_v24 = vmul.f32 %v460_v22, %v420_v0  ;;  %v3854_v0 = vld [vmem:[#allocation7 + $0x30] sm:$0xff]   ;;  %v803_v22 = vld [vmem:[#allocation10 + $0x118] sm:$0xff] }
 0x295   :  { %594 = vmatmul.mubr.f32.gmra.mrb[12].mxu1 %v308_v31  ;;  %v479_v31 = vmul.f32 %v3343_v62, %v470_v28  ;;  %v819_v62 = vld [vmem:[#allocation10 + $0x198] sm:$0xff] }
 0x296   :  { %598 = vmatprep.mubr.f32.mxu1 %v475_v1  ;;  %v3578_v1 = vpack.c.bf16 %v801_v60, %v800_v59  ;;  %v3580_v2 = vpack.c.bf16 %v819_v62, %v818_v61  ;;  %v754_v60 = vpop.permute.xlu0 %753 }
 0x299   :  { %599 = vmatmul.mubr.f32.gmra.mrb[14].mxu1 %v309_v30 }
 0x29a   :  { %603 = vmatprep.mubr.f32.mxu1 %v476_v3  ;;  %v802_v3 = vld [vmem:[#allocation10 + $0x110] sm:$0xff] }
 0x29d   :  { %604 = vmatmul.mubr.f32.gmra.mrb[16].mxu1 %v310_v38 }
 0x29e   :  { %608 = vmatprep.mubr.f32.mxu1 %v477_v24  ;;  %v820_v24 = vld [vmem:[#allocation10 + $0x1a0] sm:$0xff] }
 0x29f   :  { %v3584_v28 = vpack.c.bf16 %v821_v20, %v820_v24 }
 0x2a1   :  { %609 = vmatmul.mubr.f32.gmra.mrb[18].mxu1 %v311_v37 }
 0x2a2   :  { %613 = vmatprep.mubr.f32.mxu1 %v478_v23  ;;  %v3582_v23 = vpack.c.bf16 %v803_v22, %v802_v3  ;;  %v764_v3 = vpop.permute.xlu0 %763 }
 0x2a5   :  { %614 = vmatmul.mubr.f32.gmra.mrb[20].mxu1 %v312_v47 }
 0x2a6   :  { %618 = vmatprep.mubr.f32.mxu1 %v479_v31  ;;  %v804_v31 = vld [vmem:[#allocation10 + $0x120] sm:$0xff] }
 0x2a9   :  { %619 = vmatmul.mubr.f32.gmra.mrb[22].mxu1 %v313_v44 }
 0x360   :  { %v2836_v30 = vpop.f32.mrb[8].mxu1 }
 0x361   :  { %v2837_v36 = vpop.f32.mrb[9].mxu1 }
 0x362   :  { %v2838_v38 = vadd.f32 %v2837_v36, %v2836_v30  ;;  %v822_v30 = vld [vmem:[#allocation10 + $0x1b0] sm:$0xff]  ;;  %v823_v36 = vld [vmem:[#allocation10 + $0x1b8] sm:$0xff] }
 0x364   :  { %v2839_v37 = vpop.f32.mrb[10].mxu1  ;;  %v4570_v5 = vadd.f32 %v2838_v38, %v2687_v33  ;;  %v3855_v38 = vld [vmem:[#allocation7 + $0x38] sm:$0xff]  }
 0x365   :  { %v2840_v4 = vpop.f32.mrb[11].mxu1 }
 0x366   :  { %v2841_v43 = vadd.f32 %v2840_v4, %v2839_v37  ;;  %v624_v44 = vmax.f32 %v4570_v5, 0.0  ;;  %v3588_v37 = vpack.c.bf16 %v823_v36, %v822_v30  ;;  %v806_v4 = vld [vmem:[#allocation10 + $0x130] sm:$0xff]  ;;  %v774_v30 = vpop.permute.xlu0 %773 }
 0x368   :  { %v4572_v47 = vadd.f32 %v2841_v43, %v2687_v33  ;;  %v2842_v6 = vpop.f32.mrb[12].mxu1  ;;  %v807_v43 = vld [vmem:[#allocation10 + $0x138] sm:$0xff] }
 0x369   :  { %v2843_v40 = vpop.f32.mrb[13].mxu1 }
 0x36a   :  { %v625_v7 = vmax.f32 %v4572_v47, 0.0  ;;  %v2844_v8 = vadd.f32 %v2843_v40, %v2842_v6  ;;  %v824_v6 = vld [vmem:[#allocation10 + $0x1c0] sm:$0xff]  ;;  %v825_v40 = vld [vmem:[#allocation10 + $0x1c8] sm:$0xff]  ;;  %v784_v47 = vpop.permute.xlu0 %783 }
 0x36c   :  { %v2845_v9 = vpop.f32.mrb[14].mxu1  ;;  %v650_v10 = vpack.c.bf16 %v625_v7, %v624_v44  ;;  %v4580_v12 = vadd.f32 %v2844_v8, %v2687_v33  ;;  %v3590_v8 = vpack.c.bf16 %v807_v43, %v806_v4  ;;  %v1123_v43 = vld [vmem:[#allocation10 + $0x210] sm:$0xff] }
 0x36d   :  { %v2846_v11 = vpop.f32.mrb[15].mxu1 }
 0x36e   :  { %v2847_v13 = vadd.f32 %v2846_v11, %v2845_v9  ;;  %3344 = vmatprep.subr.bf16.mxu0 %v650_v10  ;;  %v626_v17 = vmax.f32 %v4580_v12, 0.0  ;;  %v3592_v9 = vpack.c.bf16 %v825_v40, %v824_v6  ;;  %v809_v11 = vld [vmem:[#allocation10 + $0x148] sm:$0xff]  ;;  %v1124_v6 = vld [vmem:[#allocation10 + $0x218] sm:$0xff]  ;;  %v1125_v40 = vld [vmem:[#allocation10 + $0x220] sm:$0xff] }
 0x36f   :  { %3345 = vmatpush3.bf16.msra.mxu0 %v650_v10  ;;  %v808_v10 = vld [vmem:[#allocation10 + $0x140] sm:$0xff] }
 0x370   :  { %v4582_v14 = vadd.f32 %v2847_v13, %v2687_v33  ;;  %v2848_v15 = vpop.f32.mrb[16].mxu1  ;;  %v826_v13 = vld [vmem:[#allocation10 + $0x1d0] sm:$0xff] }
 0x371   :  { %v2849_v16 = vpop.f32.mrb[17].mxu1 }
 0x372   :  { %v627_v18 = vmax.f32 %v4582_v14, 0.0  ;;  %v2850_v19 = vadd.f32 %v2849_v16, %v2848_v15  ;;  %v827_v15 = vld [vmem:[#allocation10 + $0x1d8] sm:$0xff]  ;;  %v3594_v16 = vpack.c.bf16 %v809_v11, %v808_v10  ;;  %v3856_v14 = vld [vmem:[#allocation7 + $0x40] sm:$0xff]  }
 0x373   :  { %3368 = vmatprep.mubr.msk.bf16.mxu1 %vm354_vm0, %v3856_v14  ;;  %v1144_v10 = vld [vmem:[#allocation10 + $0x2b8] sm:$0xff] }
 0x374   :  { %v2851_v21 = vpop.f32.mrb[18].mxu1  ;;  %v651_v25 = vpack.c.bf16 %v627_v18, %v626_v17  ;;  %v4590_v29 = vadd.f32 %v2850_v19, %v2687_v33  ;;  %v3596_v19 = vpack.c.bf16 %v827_v15, %v826_v13  ;;  %v1127_v15 = vld [vmem:[#allocation10 + $0x230] sm:$0xff] }
 0x375   :  { %v2852_v27 = vpop.f32.mrb[19].mxu1 }
 0x376   :  { %v2853_v32 = vadd.f32 %v2852_v27, %v2851_v21  ;;  %3346 = vmatprep.subr.bf16.mxu0 %v651_v25  ;;  %v628_v41 = vmax.f32 %v4590_v29, 0.0  ;;  %v810_v21 = vld [vmem:[#allocation10 + $0x150] sm:$0xff]  ;;  %v828_v27 = vld [vmem:[#allocation10 + $0x1e0] sm:$0xff]  ;;  %v1138_v29 = vld [vmem:[#allocation10 + $0x288] sm:$0xff] }
 0x377   :  { %3347 = vmatpush3.bf16.msra.mxu0 %v651_v25  ;;  %v811_v25 = vld [vmem:[#allocation10 + $0x158] sm:$0xff] }
 0x378   :  { %v4592_v34 = vadd.f32 %v2853_v32, %v2687_v33  ;;  %v2854_v35 = vpop.f32.mrb[20].mxu1  ;;  %v829_v32 = vld [vmem:[#allocation10 + $0x1e8] sm:$0xff] }
 0x379   :  { %v2855_v39 = vpop.f32.mrb[21].mxu1 }
 0x37a   :  { %v629_v42 = vmax.f32 %v4592_v34, 0.0  ;;  %v2856_v45 = vadd.f32 %v2855_v39, %v2854_v35  ;;  %v3598_v35 = vpack.c.bf16 %v811_v25, %v810_v21  ;;  %v3600_v39 = vpack.c.bf16 %v829_v32, %v828_v27  ;;  %v1139_v34 = vld [vmem:[#allocation10 + $0x290] sm:$0xff]  ;;  %v1146_v21 = vld [vmem:[#allocation10 + $0x2c8] sm:$0xff]  ;;  %v1129_v32 = vld [vmem:[#allocation10 + $0x240] sm:$0xff] }
 0x37c   :  { %v2857_v46 = vpop.f32.mrb[22].mxu1  ;;  %v652_v48 = vpack.c.bf16 %v629_v42, %v628_v41  ;;  %v4600_v50 = vadd.f32 %v2856_v45, %v2687_v33  ;;  %v812_v45 = vld [vmem:[#allocation10 + $0x160] sm:$0xff] }
 0x37d   :  { %v2858_v49 = vpop.f32.mrb[23].mxu1 }
 0x37e   :  { %v2859_v51 = vadd.f32 %v2858_v49, %v2857_v46  ;;  %3348 = vmatprep.subr.bf16.mxu0 %v652_v48  ;;  %v630_v55 = vmax.f32 %v4600_v50, 0.0  ;;  %v813_v46 = vld [vmem:[#allocation10 + $0x168] sm:$0xff]  ;;  %v830_v49 = vld [vmem:[#allocation10 + $0x1f0] sm:$0xff]  ;;  %v1141_v50 = vld [vmem:[#allocation10 + $0x2a0] sm:$0xff] }
 0x37f   :  { %3349 = vmatpush3.bf16.msra.mxu0 %v652_v48  ;;  %v3602_v48 = vpack.c.bf16 %v813_v46, %v812_v45  ;;  %v1148_v45 = vld [vmem:[#allocation10 + $0x2d8] sm:$0xff] }
 0x380   :  { %v4602_v52 = vadd.f32 %v2859_v51, %v2687_v33  ;;  %v3586_v33 = vpack.c.bf16 %v805_v26, %v804_v31  ;;  %v831_v51 = vld [vmem:[#allocation10 + $0x1f8] sm:$0xff] }
 0x381   :  { %v3604_v53 = vpack.c.bf16 %v831_v51, %v830_v49  ;;  %v1131_v49 = vld [vmem:[#allocation10 + $0x250] sm:$0xff]  ;;  %v1132_v51 = vld [vmem:[#allocation10 + $0x258] sm:$0xff] }
 0x382   :  { %v631_v56 = vmax.f32 %v4602_v52, 0.0  ;;  %v3614_v52 = vpack.c.bf16 %v1124_v6, %v1123_v43 }
 0x384   :  { %v653_v57 = vpack.c.bf16 %v631_v56, %v630_v55 }
 0x386   :  { %3350 = vmatprep.subr.bf16.mxu0 %v653_v57 }
 0x387   :  { %3351 = vmatpush3.bf16.msra.mxu0 %v653_v57  ;;  %v815_v57 = vld [vmem:[#allocation10 + $0x178] sm:$0xff] }
 0x388   :  { %3577 = vmatprep.subr.bf16.mxu0 %v3576_v58  ;;  %v3606_v58 = vpack.c.bf16 %v815_v57, %v814_v54  ;;  %v1150_v54 = vld [vmem:[#allocation10 + $0x2e8] sm:$0xff]  ;;  %v3630_v57 = vpack.c.bf16 %v1132_v51, %v1131_v49  ;;  %v1280_v51 = vld [vmem:[#allocation11 + $0x30] sm:$0xff] }
 0x38a   :  { %3353 = vmatmul.mubr.msk.bf16.vlgmr.msra.gmra.mrb[8].mxu0 %vm354_vm0, %v3853_v63 }
 0x38b   :  { %3356 = vmatprep.mubr.msk.bf16.mxu0 %vm354_vm0, %v3854_v0  ;;  %3579 = vmatpush3.bf16.msra.mxu0 %v3578_v1  ;;  %v759_v0 = vpop.permute.xlu1 %758 }
 0x38c   :  { %3581 = vmatprep.subr.bf16.mxu0 %v3580_v2 }
 0x38f   :  { %3583 = vmatpush3.bf16.msra.mxu0 %v3582_v23 }
 0x390   :  { %3585 = vmatprep.subr.bf16.mxu0 %v3584_v28  ;;  %v769_v28 = vpop.permute.xlu1 %768 }
 0x392   :  { %3357 = vmatmul.mubr.msk.bf16.gmra.mrb[12].mxu0 %vm354_vm0, %v3855_v38 }
 0x393   :  { %3587 = vmatpush3.bf16.msra.mxu0 %v3586_v33  ;;  %v1122_v33 = vld [vmem:[#allocation10 + $0x208] sm:$0xff] }
 0x394   :  { %3589 = vmatprep.subr.bf16.mxu0 %v3588_v37 }
 0x397   :  { %3591 = vmatpush3.bf16.msra.mxu0 %v3590_v8  ;;  %v1126_v8 = vld [vmem:[#allocation10 + $0x228] sm:$0xff] }
 0x398   :  { %3593 = vmatprep.subr.bf16.mxu0 %v3592_v9  ;;  %v1143_v9 = vld [vmem:[#allocation10 + $0x2b0] sm:$0xff]  ;;  %v3618_v11 = vpack.c.bf16 %v1126_v8, %v1125_v40 }
 0x399   :  { %v3620_v13 = vpack.c.bf16 %v1144_v10, %v1143_v9 }
 0x39b   :  { %3595 = vmatpush3.bf16.msra.mxu0 %v3594_v16  ;;  %v1128_v16 = vld [vmem:[#allocation10 + $0x238] sm:$0xff] }
 0x39c   :  { %3597 = vmatprep.subr.bf16.mxu0 %v3596_v19  ;;  %v1145_v19 = vld [vmem:[#allocation10 + $0x2c0] sm:$0xff]  ;;  %v3622_v25 = vpack.c.bf16 %v1128_v16, %v1127_v15  ;;  %v1275_v15 = vld [vmem:[#allocation11 + $0x8] sm:$0xff] }
 0x39d   :  { %v3624_v27 = vpack.c.bf16 %v1146_v21, %v1145_v19 }
 0x39f   :  { %3599 = vmatpush3.bf16.msra.mxu0 %v3598_v35  ;;  %v1130_v35 = vld [vmem:[#allocation10 + $0x248] sm:$0xff] }
 0x3a0   :  { %3601 = vmatprep.subr.bf16.mxu0 %v3600_v39  ;;  %v1147_v39 = vld [vmem:[#allocation10 + $0x2d0] sm:$0xff]  ;;  %v3626_v46 = vpack.c.bf16 %v1130_v35, %v1129_v32  ;;  %v1277_v32 = vld [vmem:[#allocation11 + $0x18] sm:$0xff]  ;;  %v3857_v35 = vld [vmem:[#allocation7 + $0x48] sm:$0xff]  }
 0x3a3   :  { %3603 = vmatpush3.bf16.msra.mxu0 %v3602_v48  ;;  %v3628_v48 = vpack.c.bf16 %v1148_v45, %v1147_v39  ;;  %v3858_v39 = vld [vmem:[#allocation7 + $0x50] sm:$0xff]  }
 0x3a4   :  { %3605 = vmatprep.subr.bf16.mxu0 %v3604_v53  ;;  %v1149_v53 = vld [vmem:[#allocation10 + $0x2e0] sm:$0xff] }
 0x3a7   :  { %3607 = vmatpush3.bf16.msra.mxu0 %v3606_v58  ;;  %v3632_v58 = vpack.c.bf16 %v1150_v54, %v1149_v53  ;;  %v1281_v53 = vld [vmem:[#allocation11 + $0x38] sm:$0xff] }
 0x3a8   :  { %v3859_v54 = vld [vmem:[#allocation7 + $0x58] sm:$0xff]  }
 0x45d   :  { %v3354_v59 = vpop.f32.mrb[8].mxu0 }
 0x45e   :  { %v720_v61 = vpop.f32.mrb[9].mxu0  ;;  %v793_v22 = vmul.f32 %v3354_v59, %v764_v3  ;;  %v1133_v59 = vld [vmem:[#allocation10 + $0x260] sm:$0xff] }
 0x45f   :  { %v791_v62 = vmul.f32 %v754_v60, %v720_v61  ;;  %v3355_v63 = vpop.f32.mrb[10].mxu0  ;;  %v1134_v60 = vld [vmem:[#allocation10 + $0x268] sm:$0xff] }
 0x460   :  { %v723_v1 = vpop.f32.mrb[11].mxu0  ;;  %v794_v26 = vmul.f32 %v3355_v63, %v769_v28  ;;  %v3634_v61 = vpack.c.bf16 %v1134_v60, %v1133_v59  ;;  %v1282_v59 = vld [vmem:[#allocation11 + $0x40] sm:$0xff]  ;;  %v1283_v60 = vld [vmem:[#allocation11 + $0x48] sm:$0xff] }
 0x461   :  { %v792_v2 = vmul.f32 %v759_v0, %v723_v1  ;;  %904 = vmatprep.mubr.f32.mxu0 %v791_v62  ;;  %v2705_v1 = vld [vmem:[%s5035_s9 + $0x1] ss:$0 sm:$0xff] }
 0x462   :  { %905 = vmatmul.mubr.f32.vlgmr.msra.gmra.mrb[16].mxu0 %v624_v44  ;;  %v779_v44 = vpop.permute.xlu1 %778 }
 0x463   :  { %909 = vmatprep.mubr.f32.mxu0 %v792_v2 }
 0x465   :  { %v3358_v24 = vpop.f32.mrb[12].mxu0 }
 0x466   :  { %v736_v20 = vpop.f32.mrb[13].mxu0  ;;  %910 = vmatmul.mubr.f32.gmra.mrb[18].mxu0 %v625_v7  ;;  %v797_v7 = vmul.f32 %v3358_v24, %v784_v47  ;;  %v789_v12 = vpop.permute.xlu1 %788 }
 0x467   :  { %v3359_v23 = vpop.f32.mrb[14].mxu0  ;;  %914 = vmatprep.mubr.f32.mxu0 %v793_v22  ;;  %v795_v5 = vmul.f32 %v774_v30, %v736_v20 }
 0x468   :  { %v739_v31 = vpop.f32.mrb[15].mxu0 }
 0x469   :  { %v796_v36 = vmul.f32 %v779_v44, %v739_v31 }
 0x46a   :  { %915 = vmatmul.mubr.f32.gmra.mrb[20].mxu0 %v626_v17  ;;  %v798_v17 = vmul.f32 %v3359_v23, %v789_v12 }
 0x46b   :  { %919 = vmatprep.mubr.f32.mxu0 %v794_v26 }
 0x46e   :  { %920 = vmatmul.mubr.f32.gmra.mrb[22].mxu0 %v627_v18  ;;  %v1137_v18 = vld [vmem:[#allocation10 + $0x280] sm:$0xff] }
 0x46f   :  { %924 = vmatprep.mubr.f32.mxu0 %v795_v5  ;;  %v3608_v38 = vpack.c.bf16 %v1138_v29, %v1137_v18 }
 0x471   :  { %3609 = vmatprep.subr.bf16.mxu0 %v3608_v38 }
 0x472   :  { %925 = vmatmul.mubr.f32.gmra.mrb[24].mxu0 %v628_v41  ;;  %v1121_v41 = vld [vmem:[#allocation10 + $0x200] sm:$0xff] }
 0x473   :  { %929 = vmatprep.mubr.f32.mxu0 %v796_v36  ;;  %v3610_v37 = vpack.c.bf16 %v1122_v33, %v1121_v41 }
 0x475   :  { %3611 = vmatpush3.bf16.msra.mxu0 %v3610_v37 }
 0x476   :  { %930 = vmatmul.mubr.f32.gmra.mrb[26].mxu0 %v629_v42  ;;  %v1140_v42 = vld [vmem:[#allocation10 + $0x298] sm:$0xff] }
 0x477   :  { %934 = vmatprep.mubr.f32.mxu0 %v797_v7  ;;  %v3612_v4 = vpack.c.bf16 %v1140_v42, %v1139_v34 }
 0x479   :  { %3613 = vmatprep.subr.bf16.mxu0 %v3612_v4 }
 0x47a   :  { %935 = vmatmul.mubr.f32.gmra.mrb[28].mxu0 %v630_v55  ;;  %v1142_v55 = vld [vmem:[#allocation10 + $0x2a8] sm:$0xff] }
 0x47b   :  { %939 = vmatprep.mubr.f32.mxu0 %v798_v17  ;;  %3615 = vmatpush3.bf16.msra.mxu0 %v3614_v52 }
 0x47e   :  { %940 = vmatmul.mubr.f32.gmra.mrb[30].mxu0 %v631_v56  ;;  %v3616_v56 = vpack.c.bf16 %v1142_v55, %v1141_v50 }
 0x480   :  { %3617 = vmatprep.subr.bf16.mxu0 %v3616_v56 }
 0x481   :  { %3619 = vmatpush3.bf16.msra.mxu0 %v3618_v11 }
 0x482   :  { %3621 = vmatprep.subr.bf16.mxu0 %v3620_v13  ;;  %v1274_v13 = vld [vmem:[#allocation11] sm:$0xff] }
 0x485   :  { %3623 = vmatpush3.bf16.msra.mxu0 %v3622_v25  ;;  %v3640_v25 = vpack.c.bf16 %v1275_v15, %v1274_v13  ;;  %v1080_v13 = vpop.permute.xlu1 %1079 }
 0x486   :  { %3625 = vmatprep.subr.bf16.mxu0 %v3624_v27  ;;  %v1276_v27 = vld [vmem:[#allocation11 + $0x10] sm:$0xff] }
 0x487   :  { %v3644_v45 = vpack.c.bf16 %v1277_v32, %v1276_v27 }
 0x489   :  { %3627 = vmatpush3.bf16.msra.mxu0 %v3626_v46  ;;  %v1278_v46 = vld [vmem:[#allocation11 + $0x20] sm:$0xff] }
 0x48a   :  { %3629 = vmatprep.subr.bf16.mxu0 %v3628_v48  ;;  %v1279_v48 = vld [vmem:[#allocation11 + $0x28] sm:$0xff] }
 0x48b   :  { %v3648_v49 = vpack.c.bf16 %v1279_v48, %v1278_v46 }
 0x48d   :  { %3631 = vmatpush3.bf16.msra.mxu0 %v3630_v57  ;;  %v3652_v57 = vpack.c.bf16 %v1281_v53, %v1280_v51 }
 0x48e   :  { %3633 = vmatprep.subr.bf16.mxu0 %v3632_v58  ;;  %v1266_v58 = vld [vmem:[#allocation5] sm:$0xff] }
 0x491   :  { %3635 = vmatpush3.bf16.msra.mxu0 %v3634_v61  ;;  %v3656_v61 = vpack.c.bf16 %v1283_v60, %v1282_v59 }
 0x535   :  { %v2900_v62 = vpop.f32.mrb[16].mxu0 }
 0x536   :  { %v2901_v63 = vpop.f32.mrb[17].mxu0 }
 0x537   :  { %v2902_v0 = vadd.f32 %v2901_v63, %v2900_v62  ;;  %v1284_v62 = vld [vmem:[#allocation11 + $0x50] sm:$0xff]  ;;  %v1285_v63 = vld [vmem:[#allocation11 + $0x58] sm:$0xff] }
 0x539   :  { %v2903_v2 = vpop.f32.mrb[18].mxu0  ;;  %v4633_v22 = vadd.f32 %v2902_v0, %v2705_v1  ;;  %v3660_v0 = vpack.c.bf16 %v1285_v63, %v1284_v62 }
 0x53a   :  { %v2904_v3 = vpop.f32.mrb[19].mxu0 }
 0x53b   :  { %v2905_v24 = vadd.f32 %v2904_v3, %v2903_v2  ;;  %v945_v31 = vmax.f32 %v4633_v22, 0.0  ;;  %v1287_v2 = vld [vmem:[#allocation11 + $0x68] sm:$0xff] }
 0x53d   :  { %v4635_v20 = vadd.f32 %v2905_v24, %v2705_v1  ;;  %v2906_v23 = vpop.f32.mrb[20].mxu0  ;;  %v1288_v24 = vld [vmem:[#allocation11 + $0x70] sm:$0xff] }
 0x53e   :  { %v2907_v28 = vpop.f32.mrb[21].mxu0 }
 0x53f   :  { %v946_v26 = vmax.f32 %v4635_v20, 0.0  ;;  %v2908_v30 = vadd.f32 %v2907_v28, %v2906_v23  ;;  %v1289_v23 = vld [vmem:[#allocation11 + $0x78] sm:$0xff] }
 0x540   :  { %v3668_v28 = vpack.c.bf16 %v1289_v23, %v1288_v24 }
 0x541   :  { %v2909_v5 = vpop.f32.mrb[22].mxu0  ;;  %v971_v44 = vpack.c.bf16 %v946_v26, %v945_v31  ;;  %v4643_v47 = vadd.f32 %v2908_v30, %v2705_v1  ;;  %v1267_v30 = vld [vmem:[#allocation5 + $0x8] sm:$0xff] }
 0x542   :  { %v2910_v36 = vpop.f32.mrb[23].mxu0 }
 0x543   :  { %v2911_v7 = vadd.f32 %v2910_v36, %v2909_v5  ;;  %3360 = vmatprep.subr.bf16.mxu1 %v971_v44  ;;  %v947_v18 = vmax.f32 %v4643_v47, 0.0  ;;  %v1268_v5 = vld [vmem:[#allocation5 + $0x10] sm:$0xff]  ;;  %v1270_v36 = vld [vmem:[#allocation5 + $0x20] sm:$0xff] }
 0x544   :  { %3361 = vmatpush3.bf16.msra.mxu1 %v971_v44  ;;  %v1269_v44 = vld [vmem:[#allocation5 + $0x18] sm:$0xff] }
 0x545   :  { %v4645_v12 = vadd.f32 %v2911_v7, %v2705_v1  ;;  %v2912_v17 = vpop.f32.mrb[24].mxu0  ;;  %v1271_v7 = vld [vmem:[#allocation5 + $0x28] sm:$0xff] }
 0x546   :  { %v2913_v14 = vpop.f32.mrb[25].mxu0 }
 0x547   :  { %v948_v29 = vmax.f32 %v4645_v12, 0.0  ;;  %v2914_v41 = vadd.f32 %v2913_v14, %v2912_v17  ;;  %v1272_v17 = vld [vmem:[#allocation5 + $0x30] sm:$0xff]  ;;  %v1273_v14 = vld [vmem:[#allocation5 + $0x38] sm:$0xff]  ;;  %v2724_v12 = vld [vmem:[%s5037_s11] ss:$0 sm:$0xff]  ;;  %s4048_s11 = scalar_lea.vmem %s2663_s8, 1024 }
 0x548   :  { %p4049_p8 = scmp.ne.s32.totalorder %s2663_s8, %s4048_s11  ;;  %p4054_p10 = scmp.lt.s32.totalorder %s4048_s11, %s4048_s11 }
 0x549   :  { %v2915_v38 = vpop.f32.mrb[26].mxu0  ;;  %v972_v33 = vpack.c.bf16 %v948_v29, %v947_v18  ;;  %v4653_v42 = vadd.f32 %v2914_v41, %v2705_v1  ;;  %v1151_v41 = vld [vmem:[#allocation10 + $0x2f0] sm:$0xff] }
 0x54a   :  { %v2916_v34 = vpop.f32.mrb[27].mxu0  ;;  %p4055_p11 = por %p4054_p10, %p4053_p9 }
 0x54b   :  { %v2917_v37 = vadd.f32 %v2916_v34, %v2915_v38  ;;  %3362 = vmatprep.subr.bf16.mxu1 %v972_v33  ;;  %v949_v50 = vmax.f32 %v4653_v42, 0.0  ;;  %v1152_v38 = vld [vmem:[#allocation10 + $0x2f8] sm:$0xff]  ;;  %v1135_v34 = vld [vmem:[#allocation10 + $0x270] sm:$0xff] }
 0x54c   :  { %3363 = vmatpush3.bf16.msra.mxu1 %v972_v33  ;;  %v3636_v33 = vpack.c.bf16 %v1152_v38, %v1151_v41  ;;  %v1592_v41 = vld [vmem:[#allocation13 + $0x88] sm:$0xff]  ;;  %p4056_p12 = pnand %p4055_p11, %p4049_p8 }
 0x54d   :  { %v4655_v4 = vadd.f32 %v2917_v37, %v2705_v1  ;;  %v2918_v43 = vpop.f32.mrb[28].mxu0  ;;  %v1136_v37 = vld [vmem:[#allocation10 + $0x278] sm:$0xff] }
 0x54e   :  { %v2919_v6 = vpop.f32.mrb[29].mxu0  ;;  %3637 = vmatprep.subr.bf16.mxu0 %v3636_v33  ;;  %v1575_v33 = vld [vmem:[#allocation13] sm:$0xff] }
 0x54f   :  { %v950_v55 = vmax.f32 %v4655_v4, 0.0  ;;  %v2920_v52 = vadd.f32 %v2919_v6, %v2918_v43  ;;  %v3638_v43 = vpack.c.bf16 %v1136_v37, %v1135_v34  ;;  %v3860_v6 = vld [vmem:[#allocation8] sm:$0xff]   ;;  %v1576_v34 = vld [vmem:[#allocation13 + $0x8] sm:$0xff] }
 0x550   :  { %v3674_v37 = vpack.c.bf16 %v1576_v34, %v1575_v33 }
 0x551   :  { %v2921_v56 = vpop.f32.mrb[30].mxu0  ;;  %v973_v40 = vpack.c.bf16 %v950_v55, %v949_v50  ;;  %v4663_v9 = vadd.f32 %v2920_v52, %v2705_v1  ;;  %3639 = vmatpush3.bf16.msra.mxu0 %v3638_v43  ;;  %v1593_v43 = vld [vmem:[#allocation13 + $0x90] sm:$0xff] }
 0x552   :  { %v2922_v8 = vpop.f32.mrb[31].mxu0 }
 0x553   :  { %v2923_v10 = vadd.f32 %v2922_v8, %v2921_v56  ;;  %3364 = vmatprep.subr.bf16.mxu1 %v973_v40  ;;  %v951_v16 = vmax.f32 %v4663_v9, 0.0  ;;  %v1075_v56 = vpop.permute.xlu0 %1074 }
 0x554   :  { %3365 = vmatpush3.bf16.msra.mxu1 %v973_v40 }
 0x555   :  { %v4665_v11 = vadd.f32 %v2923_v10, %v2705_v1  ;;  %v1286_v1 = vld [vmem:[#allocation11 + $0x60] sm:$0xff] }
 0x556   :  { %v3664_v3 = vpack.c.bf16 %v1287_v2, %v1286_v1 }
 0x557   :  { %v952_v19 = vmax.f32 %v4665_v11, 0.0 }
 0x559   :  { %v974_v21 = vpack.c.bf16 %v952_v19, %v951_v16 }
 0x55b   :  { %3366 = vmatprep.subr.bf16.mxu1 %v974_v21 }
 0x55c   :  { %3367 = vmatpush3.bf16.msra.mxu1 %v974_v21 }
 0x55d   :  { %3641 = vmatprep.subr.bf16.mxu1 %v3640_v25 }
 0x55f   :  { %3369 = vmatmul.mubr.msk.bf16.vlgmr.msra.gmra.mrb[24].mxu1 %vm354_vm0, %v3857_v35 }
 0x560   :  { %3643 = vmatpush3.bf16.msra.mxu1 %v3640_v25  ;;  %3372 = vmatprep.mubr.msk.bf16.mxu1 %vm354_vm0, %v3858_v39  ;;  %v1085_v25 = vpop.permute.xlu0 %1084 }
 0x561   :  { %3645 = vmatprep.subr.bf16.mxu1 %v3644_v45 }
 0x564   :  { %3647 = vmatpush3.bf16.msra.mxu1 %v3644_v45  ;;  %v1090_v45 = vpop.permute.xlu1 %1089 }
 0x565   :  { %3649 = vmatprep.subr.bf16.mxu1 %v3648_v49 }
 0x567   :  { %3373 = vmatmul.mubr.msk.bf16.gmra.mrb[28].mxu1 %vm354_vm0, %v3859_v54 }
 0x568   :  { %3651 = vmatpush3.bf16.msra.mxu1 %v3648_v49  ;;  %3408 = vmatprep.mubr.f32.mxu1 %v1266_v58  ;;  %v1095_v49 = vpop.permute.xlu0 %1094 }
 0x569   :  { %3653 = vmatprep.subr.bf16.mxu1 %v3652_v57 }
 0x56c   :  { %3655 = vmatpush3.bf16.msra.mxu1 %v3652_v57  ;;  %v1105_v20 = vpop.permute.xlu0 %1104 }
 0x56d   :  { %3657 = vmatprep.subr.bf16.mxu1 %v3656_v61 }
 0x570   :  { %3659 = vmatpush3.bf16.msra.mxu1 %v3656_v61 }
 0x571   :  { %3661 = vmatprep.subr.bf16.mxu1 %v3660_v0 }
 0x574   :  { %3663 = vmatpush3.bf16.msra.mxu1 %v3660_v0 }
 0x575   :  { %3665 = vmatprep.subr.bf16.mxu1 %v3664_v3 }
 0x578   :  { %3667 = vmatpush3.bf16.msra.mxu1 %v3664_v3 }
 0x579   :  { %3669 = vmatprep.subr.bf16.mxu1 %v3668_v28 }
 0x57c   :  { %3671 = vmatpush3.bf16.msra.mxu1 %v3668_v28 }
 0x57f   :  { %3409 = vmatmul.mubr.f32.vlgmr.msra.gmra.mrb[32].mxu1 %v1267_v30 }
 0x580   :  { %3411 = vmatprep.mubr.f32.mxu1 %v1268_v5 }
 0x583   :  { %3412 = vmatmul.mubr.f32.gmra.mrb[34].mxu1 %v1269_v44 }
 0x584   :  { %3414 = vmatprep.mubr.f32.mxu1 %v1270_v36  ;;  %v3861_v36 = vld [vmem:[#allocation8 + $0x8] sm:$0xff]  }
 0x587   :  { %3415 = vmatmul.mubr.f32.gmra.mrb[36].mxu1 %v1271_v7  ;;  %v3862_v7 = vld [vmem:[#allocation8 + $0x10] sm:$0xff]  }
 0x588   :  { %3417 = vmatprep.mubr.f32.mxu1 %v1272_v17  ;;  %v3863_v17 = vld [vmem:[#allocation8 + $0x18] sm:$0xff]  }
 0x58b   :  { %3418 = vmatmul.mubr.f32.gmra.mrb[38].mxu1 %v1273_v14  ;;  %v1591_v14 = vld [vmem:[#allocation13 + $0x80] sm:$0xff] }
 0x58c   :  { %3428 = vmatprep.mubr.msk.bf16.mxu1 %vm354_vm0, %v3860_v6  ;;  %v3672_v38 = vpack.c.bf16 %v1592_v41, %v1591_v14  ;;  %v1594_v6 = vld [vmem:[#allocation13 + $0x98] sm:$0xff] }
 0x58e   :  { %3673 = vmatprep.subr.bf16.mxu0 %v3672_v38 }
 0x632   :  { %v3370_v52 = vpop.f32.mrb[24].mxu1 }
 0x633   :  { %v1041_v40 = vpop.f32.mrb[25].mxu1  ;;  %v1114_v27 = vmul.f32 %v3370_v52, %v1085_v25  ;;  %v3676_v52 = vpack.c.bf16 %v1594_v6, %v1593_v43  ;;  %v1580_v25 = vld [vmem:[#allocation13 + $0x28] sm:$0xff] }
 0x634   :  { %v1112_v8 = vmul.f32 %v1075_v56, %v1041_v40  ;;  %v3371_v10 = vpop.f32.mrb[26].mxu1  ;;  %v1577_v56 = vld [vmem:[#allocation13 + $0x10] sm:$0xff]  ;;  %v1578_v40 = vld [vmem:[#allocation13 + $0x18] sm:$0xff] }
 0x635   :  { %v1044_v15 = vpop.f32.mrb[27].mxu1  ;;  %v1115_v48 = vmul.f32 %v3371_v10, %v1090_v45  ;;  %v1595_v10 = vld [vmem:[#allocation13 + $0xa0] sm:$0xff]  ;;  %v1581_v45 = vld [vmem:[#allocation13 + $0x30] sm:$0xff] }
 0x636   :  { %v1113_v21 = vmul.f32 %v1080_v13, %v1044_v15  ;;  %1225 = vmatprep.mubr.f32.mxu0 %v1112_v8  ;;  %v3678_v8 = vpack.c.bf16 %v1578_v40, %v1577_v56  ;;  %v1596_v13 = vld [vmem:[#allocation13 + $0xa8] sm:$0xff] }
 0x637   :  { %1226 = vmatmul.mubr.f32.vlgmr.msra.gmra.mrb[32].mxu0 %v945_v31  ;;  %v1100_v31 = vpop.permute.xlu1 %1099  ;;  %v3680_v15 = vpack.c.bf16 %v1596_v13, %v1595_v10 }
 0x638   :  { %1230 = vmatprep.mubr.f32.mxu0 %v1113_v21  ;;  %3675 = vmatpush3.bf16.msra.mxu0 %v3674_v37  ;;  %v1579_v21 = vld [vmem:[#allocation13 + $0x20] sm:$0xff] }
 0x639   :  { %3677 = vmatprep.subr.bf16.mxu0 %v3676_v52 }
 0x63a   :  { %v3374_v32 = vpop.f32.mrb[28].mxu1 }
 0x63b   :  { %v1057_v35 = vpop.f32.mrb[29].mxu1  ;;  %1231 = vmatmul.mubr.f32.gmra.mrb[34].mxu0 %v946_v26  ;;  %v1118_v26 = vmul.f32 %v3374_v32, %v1105_v20  ;;  %v1110_v47 = vpop.permute.xlu1 %1109  ;;  %v1597_v32 = vld [vmem:[#allocation13 + $0xb0] sm:$0xff] }
 0x63c   :  { %v3375_v39 = vpop.f32.mrb[30].mxu1  ;;  %1235 = vmatprep.mubr.f32.mxu0 %v1114_v27  ;;  %v1116_v22 = vmul.f32 %v1095_v49, %v1057_v35  ;;  %3679 = vmatpush3.bf16.msra.mxu0 %v3678_v8  ;;  %v3682_v27 = vpack.c.bf16 %v1580_v25, %v1579_v21  ;;  %v1598_v35 = vld [vmem:[#allocation13 + $0xb8] sm:$0xff] }
 0x63d   :  { %v1060_v46 = vpop.f32.mrb[31].mxu1  ;;  %3681 = vmatprep.subr.bf16.mxu0 %v3680_v15 }
 0x63e   :  { %v1117_v51 = vmul.f32 %v1100_v31, %v1060_v46  ;;  %v1582_v46 = vld [vmem:[#allocation13 + $0x38] sm:$0xff]  ;;  %v1583_v31 = vld [vmem:[#allocation13 + $0x40] sm:$0xff] }
 0x63f   :  { %1236 = vmatmul.mubr.f32.gmra.mrb[36].mxu0 %v947_v18  ;;  %v1119_v18 = vmul.f32 %v3375_v39, %v1110_v47  ;;  %v3684_v39 = vpack.c.bf16 %v1598_v35, %v1597_v32  ;;  %v3686_v49 = vpack.c.bf16 %v1582_v46, %v1581_v45  ;;  %v1602_v47 = vld [vmem:[#allocation13 + $0xd8] sm:$0xff] }
 0x640   :  { %1240 = vmatprep.mubr.f32.mxu0 %v1115_v48  ;;  %3683 = vmatpush3.bf16.msra.mxu0 %v3682_v27  ;;  %v1599_v48 = vld [vmem:[#allocation13 + $0xc0] sm:$0xff] }
 0x641   :  { %3685 = vmatprep.subr.bf16.mxu0 %v3684_v39 }
 0x643   :  { %1241 = vmatmul.mubr.f32.gmra.mrb[38].mxu0 %v948_v29 }
 0x644   :  { %1245 = vmatprep.mubr.f32.mxu0 %v1116_v22  ;;  %v1600_v22 = vld [vmem:[#allocation13 + $0xc8] sm:$0xff]  ;;  %3687 = vmatpush3.bf16.msra.mxu0 %v3686_v49 }
 0x645   :  { %v3688_v20 = vpack.c.bf16 %v1600_v22, %v1599_v48  ;;  %v1530_v22 = vpop.permute.xlu0 %1529 }
 0x647   :  { %1246 = vmatmul.mubr.f32.gmra.mrb[40].mxu0 %v949_v50  ;;  %3689 = vmatprep.subr.bf16.mxu0 %v3688_v20 }
 0x648   :  { %1250 = vmatprep.mubr.f32.mxu0 %v1117_v51  ;;  %v1584_v51 = vld [vmem:[#allocation13 + $0x48] sm:$0xff] }
 0x64b   :  { %1251 = vmatmul.mubr.f32.gmra.mrb[42].mxu0 %v950_v55 }
 0x64c   :  { %1255 = vmatprep.mubr.f32.mxu0 %v1118_v26  ;;  %v1601_v26 = vld [vmem:[#allocation13 + $0xd0] sm:$0xff] }
 0x64f   :  { %1256 = vmatmul.mubr.f32.gmra.mrb[44].mxu0 %v951_v16 }
 0x650   :  { %1260 = vmatprep.mubr.f32.mxu0 %v1119_v18  ;;  %v3690_v18 = vpack.c.bf16 %v1584_v51, %v1583_v31 }
 0x652   :  { %v3410_v29 = vpop.f32.mrb[32].mxu1  ;;  %3691 = vmatpush3.bf16.msra.mxu0 %v3690_v18 }
 0x653   :  { %v4694_v42 = vadd.f32 %v3410_v29, %v2724_v12  ;;  %1261 = vmatmul.mubr.f32.gmra.mrb[46].mxu0 %v952_v19  ;;  %v1363_v50 = vpop.f32.mrb[33].mxu1  ;;  %v1585_v29 = vld [vmem:[#allocation13 + $0x50] sm:$0xff] }
 0x654   :  { %v4698_v4 = vadd.f32 %v2724_v12, %v1363_v50  ;;  %v1586_v50 = vld [vmem:[#allocation13 + $0x58] sm:$0xff] }
 0x655   :  { %v1403_v55 = vmax.f32 %v4694_v42, 0.0 }
 0x656   :  { %v1402_v53 = vmax.f32 %v4698_v4, 0.0  ;;  %v3413_v9 = vpop.f32.mrb[34].mxu1 }
 0x657   :  { %v4702_v16 = vadd.f32 %v3413_v9, %v2724_v12  ;;  %v1373_v54 = vpop.f32.mrb[35].mxu1  ;;  %v1603_v9 = vld [vmem:[#allocation13 + $0xe0] sm:$0xff] }
 0x658   :  { %v1426_v57 = vpack.c.bf16 %v1403_v55, %v1402_v53  ;;  %v4708_v58 = vadd.f32 %v2724_v12, %v1373_v54  ;;  %v1604_v54 = vld [vmem:[#allocation13 + $0xe8] sm:$0xff] }
 0x659   :  { %v1405_v11 = vmax.f32 %v4702_v16, 0.0  ;;  %v3864_v16 = vld [vmem:[#allocation8 + $0x20] sm:$0xff]  }
 0x65a   :  { %v1404_v19 = vmax.f32 %v4708_v58, 0.0  ;;  %v3416_v59 = vpop.f32.mrb[36].mxu1  ;;  %3420 = vmatprep.subr.bf16.mxu1 %v1426_v57 }
 0x65b   :  { %v4712_v60 = vadd.f32 %v3416_v59, %v2724_v12  ;;  %v1383_v61 = vpop.f32.mrb[37].mxu1  ;;  %3421 = vmatpush3.bf16.msra.mxu1 %v1426_v57  ;;  %v3694_v57 = vpack.c.bf16 %v1586_v50, %v1585_v29  ;;  %v3696_v59 = vpack.c.bf16 %v1604_v54, %v1603_v9 }
 0x65c   :  { %v1427_v62 = vpack.c.bf16 %v1405_v11, %v1404_v19  ;;  %v4718_v63 = vadd.f32 %v2724_v12, %v1383_v61  ;;  %v1587_v61 = vld [vmem:[#allocation13 + $0x60] sm:$0xff] }
 0x65d   :  { %v1407_v0 = vmax.f32 %v4712_v60, 0.0  ;;  %v1913_v60 = vld [vmem:[#allocation13 + $0x190] sm:$0xff] }
 0x65e   :  { %v1406_v1 = vmax.f32 %v4718_v63, 0.0  ;;  %v3419_v2 = vpop.f32.mrb[38].mxu1  ;;  %3422 = vmatprep.subr.bf16.mxu1 %v1427_v62  ;;  %v1912_v63 = vld [vmem:[#allocation13 + $0x188] sm:$0xff] }
 0x65f   :  { %v4722_v3 = vadd.f32 %v3419_v2, %v2724_v12  ;;  %v1393_v24 = vpop.f32.mrb[39].mxu1  ;;  %3423 = vmatpush3.bf16.msra.mxu1 %v1427_v62  ;;  %v1588_v62 = vld [vmem:[#allocation13 + $0x68] sm:$0xff] }
 0x660   :  { %v1428_v23 = vpack.c.bf16 %v1407_v0, %v1406_v1  ;;  %v4728_v28 = vadd.f32 %v2724_v12, %v1393_v24  ;;  %v3692_v12 = vpack.c.bf16 %v1602_v47, %v1601_v26  ;;  %v3698_v2 = vpack.c.bf16 %v1588_v62, %v1587_v61  ;;  %v1605_v24 = vld [vmem:[#allocation13 + $0xf0] sm:$0xff]  ;;  %v1535_v26 = vpop.permute.xlu1 %1534 }
 0x661   :  { %v1409_v30 = vmax.f32 %v4722_v3, 0.0 }
 0x662   :  { %v1408_v5 = vmax.f32 %v4728_v28, 0.0  ;;  %3424 = vmatprep.subr.bf16.mxu1 %v1428_v23  ;;  %3693 = vmatprep.subr.bf16.mxu0 %v3692_v12  ;;  %v1540_v12 = vpop.permute.xlu0 %1539  ;;  %v1915_v28 = vld [vmem:[#allocation13 + $0x1a0] sm:$0xff] }
 0x663   :  { %3425 = vmatpush3.bf16.msra.mxu1 %v1428_v23  ;;  %3695 = vmatpush3.bf16.msra.mxu0 %v3694_v57  ;;  %v1606_v23 = vld [vmem:[#allocation13 + $0xf8] sm:$0xff] }
 0x664   :  { %v1429_v44 = vpack.c.bf16 %v1409_v30, %v1408_v5  ;;  %3697 = vmatprep.subr.bf16.mxu0 %v3696_v59  ;;  %v1545_v57 = vpop.permute.xlu1 %1544 }
 0x666   :  { %3426 = vmatprep.subr.bf16.mxu1 %v1429_v44  ;;  %v1550_v62 = vpop.permute.xlu0 %1549 }
 0x667   :  { %3427 = vmatpush3.bf16.msra.mxu1 %v1429_v44  ;;  %3699 = vmatpush3.bf16.msra.mxu0 %v3698_v2  ;;  %v3700_v44 = vpack.c.bf16 %v1606_v23, %v1605_v24  ;;  %v1896_v23 = vld [vmem:[#allocation13 + $0x108] sm:$0xff] }
 0x669   :  { %3701 = vmatprep.subr.bf16.mxu0 %v3700_v44 }
 0x66a   :  { %3429 = vmatmul.mubr.msk.bf16.vlgmr.msra.gmra.mrb[40].mxu1 %vm354_vm0, %v3861_v36  ;;  %v1589_v36 = vld [vmem:[#allocation13 + $0x70] sm:$0xff]  ;;  %v1560_v42 = vpop.permute.xlu0 %1559 }
 0x66b   :  { %3432 = vmatprep.mubr.msk.bf16.mxu1 %vm354_vm0, %v3862_v7  ;;  %v1590_v7 = vld [vmem:[#allocation13 + $0x78] sm:$0xff] }
 0x672   :  { %3433 = vmatmul.mubr.msk.bf16.gmra.mrb[44].mxu1 %vm354_vm0, %v3863_v17  ;;  %v3702_v17 = vpack.c.bf16 %v1590_v7, %v1589_v36  ;;  %v1897_v7 = vld [vmem:[#allocation13 + $0x110] sm:$0xff] }
 0x673   :  { %3444 = vmatprep.mubr.msk.bf16.mxu1 %vm354_vm0, %v3864_v16 }
 0x674   :  { %3703 = vmatpush3.bf16.msra.mxu0 %v3702_v17  ;;  %v1898_v17 = vld [vmem:[#allocation13 + $0x118] sm:$0xff] }
 0x675   :  { %v3710_v3 = vpack.c.bf16 %v1898_v17, %v1897_v7 }
 0x70a   :  { %v2964_v14 = vpop.f32.mrb[32].mxu0 }
 0x70b   :  { %v2965_v41 = vpop.f32.mrb[33].mxu0 }
 0x70c   :  { %v4739_v38 = vadd.f32 %v2965_v41, %v2964_v14  ;;  %v1899_v14 = vld [vmem:[#allocation13 + $0x120] sm:$0xff]  ;;  %v1900_v41 = vld [vmem:[#allocation13 + $0x128] sm:$0xff] }
 0x70e   :  { %v2967_v33 = vpop.f32.mrb[34].mxu0 }
 0x70f   :  { %v2968_v34 = vpop.f32.mrb[35].mxu0 }
 0x710   :  { %v4741_v37 = vadd.f32 %v2968_v34, %v2967_v33  ;;  %v1917_v33 = vld [vmem:[#allocation13 + $0x1b0] sm:$0xff]  ;;  %v1918_v34 = vld [vmem:[#allocation13 + $0x1b8] sm:$0xff] }
 0x712   :  { %v2970_v43 = vpop.f32.mrb[36].mxu0 }
 0x713   :  { %v2971_v6 = vpop.f32.mrb[37].mxu0 }
 0x714   :  { %v4743_v52 = vadd.f32 %v2971_v6, %v2970_v43  ;;  %v3714_v43 = vpack.c.bf16 %v1900_v41, %v1899_v14  ;;  %v3716_v6 = vpack.c.bf16 %v1918_v34, %v1917_v33 }
 0x716   :  { %v2973_v56 = vpop.f32.mrb[38].mxu0 }
 0x717   :  { %v2974_v40 = vpop.f32.mrb[39].mxu0 }
 0x718   :  { %v4745_v8 = vadd.f32 %v2974_v40, %v2973_v56  ;;  %v1901_v56 = vld [vmem:[#allocation13 + $0x130] sm:$0xff]  ;;  %v1902_v40 = vld [vmem:[#allocation13 + $0x138] sm:$0xff] }
 0x71a   :  { %v2976_v10 = vpop.f32.mrb[40].mxu0 }
 0x71b   :  { %v2977_v13 = vpop.f32.mrb[41].mxu0 }
 0x71c   :  { %v4747_v15 = vadd.f32 %v2977_v13, %v2976_v10  ;;  %v1919_v10 = vld [vmem:[#allocation13 + $0x1c0] sm:$0xff]  ;;  %v1920_v13 = vld [vmem:[#allocation13 + $0x1c8] sm:$0xff] }
 0x71e   :  { %v2979_v21 = vpop.f32.mrb[42].mxu0 }
 0x71f   :  { %v2980_v25 = vpop.f32.mrb[43].mxu0 }
 0x720   :  { %v4749_v27 = vadd.f32 %v2980_v25, %v2979_v21  ;;  %v3718_v21 = vpack.c.bf16 %v1902_v40, %v1901_v56  ;;  %v3720_v25 = vpack.c.bf16 %v1920_v13, %v1919_v10 }
 0x722   :  { %v2982_v32 = vpop.f32.mrb[44].mxu0 }
 0x723   :  { %v2983_v35 = vpop.f32.mrb[45].mxu0 }
 0x724   :  { %v4751_v39 = vadd.f32 %v2983_v35, %v2982_v32  ;;  %v1903_v32 = vld [vmem:[#allocation13 + $0x140] sm:$0xff]  ;;  %v1904_v35 = vld [vmem:[#allocation13 + $0x148] sm:$0xff] }
 0x726   :  { %v2985_v45 = vpop.f32.mrb[46].mxu0 }
 0x727   :  { %v2986_v46 = vpop.f32.mrb[47].mxu0 }
 0x728   :  { %v4753_v48 = vadd.f32 %v2986_v46, %v2985_v45  ;;  %v1921_v45 = vld [vmem:[#allocation13 + $0x1d0] sm:$0xff]  ;;  %v1922_v46 = vld [vmem:[#allocation13 + $0x1d8] sm:$0xff] }
 0x73d   :  { %v3430_v49 = vpop.f32.mrb[40].mxu1 }
 0x73e   :  { %v1496_v31 = vpop.f32.mrb[41].mxu1  ;;  %v1569_v29 = vmul.f32 %v3430_v49, %v1540_v12  ;;  %v3722_v49 = vpack.c.bf16 %v1904_v35, %v1903_v32  ;;  %v1907_v12 = vld [vmem:[#allocation13 + $0x160] sm:$0xff] }
 0x73f   :  { %v1567_v51 = vmul.f32 %v1530_v22, %v1496_v31  ;;  %v3431_v20 = vpop.f32.mrb[42].mxu1  ;;  %v3724_v22 = vpack.c.bf16 %v1922_v46, %v1921_v45  ;;  %v1905_v31 = vld [vmem:[#allocation13 + $0x150] sm:$0xff] }
 0x740   :  { %v1499_v47 = vpop.f32.mrb[43].mxu1  ;;  %v1570_v61 = vmul.f32 %v3431_v20, %v1545_v57  ;;  %v1923_v20 = vld [vmem:[#allocation13 + $0x1e0] sm:$0xff] }
 0x741   :  { %v1568_v18 = vmul.f32 %v1535_v26, %v1499_v47  ;;  %1678 = vmatprep.mubr.f32.mxu0 %v1567_v51  ;;  %v1906_v51 = vld [vmem:[#allocation13 + $0x158] sm:$0xff]  ;;  %v1924_v26 = vld [vmem:[#allocation13 + $0x1e8] sm:$0xff] }
 0x742   :  { %1679 = vmatmul.mubr.f32.vlgmr.msra.gmra.mrb[48].mxu0 %v1402_v53  ;;  %v1555_v53 = vpop.permute.xlu1 %1554  ;;  %v3726_v47 = vpack.c.bf16 %v1906_v51, %v1905_v31  ;;  %v3867_v31 = vld [vmem:[#allocation8 + $0x38] sm:$0xff]   ;;  %v1925_v51 = vld [vmem:[#allocation13 + $0x1f0] sm:$0xff] }
 0x743   :  { %1683 = vmatprep.mubr.f32.mxu0 %v1568_v18  ;;  %v3728_v18 = vpack.c.bf16 %v1924_v26, %v1923_v20  ;;  %v1926_v20 = vld [vmem:[#allocation13 + $0x1f8] sm:$0xff] }
 0x744   :  { %v3732_v26 = vpack.c.bf16 %v1926_v20, %v1925_v51 }
 0x745   :  { %v3434_v50 = vpop.f32.mrb[44].mxu1 }
 0x746   :  { %v1512_v9 = vpop.f32.mrb[45].mxu1  ;;  %1684 = vmatmul.mubr.f32.gmra.mrb[50].mxu0 %v1403_v55  ;;  %v1573_v55 = vmul.f32 %v3434_v50, %v1560_v42  ;;  %v1565_v58 = vpop.permute.xlu1 %1564 }
 0x747   :  { %v3435_v54 = vpop.f32.mrb[46].mxu1  ;;  %1688 = vmatprep.mubr.f32.mxu0 %v1569_v29  ;;  %v1571_v4 = vmul.f32 %v1550_v62, %v1512_v9  ;;  %v1908_v29 = vld [vmem:[#allocation13 + $0x168] sm:$0xff] }
 0x748   :  { %v1515_v59 = vpop.f32.mrb[47].mxu1  ;;  %v3730_v50 = vpack.c.bf16 %v1908_v29, %v1907_v12 }
 0x749   :  { %v1572_v2 = vmul.f32 %v1555_v53, %v1515_v59  ;;  %v2733_v59 = vld [vmem:[%s5039_s13] ss:$0 sm:$0xff] }
 0x74a   :  { %1689 = vmatmul.mubr.f32.gmra.mrb[52].mxu0 %v1404_v19  ;;  %v1574_v19 = vmul.f32 %v3435_v54, %v1565_v58 }
 0x74b   :  { %1693 = vmatprep.mubr.f32.mxu0 %v1570_v61 }
 0x74e   :  { %1694 = vmatmul.mubr.f32.gmra.mrb[54].mxu0 %v1405_v11  ;;  %v1911_v11 = vld [vmem:[#allocation13 + $0x180] sm:$0xff] }
 0x74f   :  { %1698 = vmatprep.mubr.f32.mxu0 %v1571_v4  ;;  %v3704_v24 = vpack.c.bf16 %v1912_v63, %v1911_v11 }
 0x751   :  { %3705 = vmatprep.subr.bf16.mxu0 %v3704_v24 }
 0x752   :  { %1699 = vmatmul.mubr.f32.gmra.mrb[56].mxu0 %v1406_v1  ;;  %v1895_v1 = vld [vmem:[#allocation13 + $0x100] sm:$0xff] }
 0x753   :  { %1703 = vmatprep.mubr.f32.mxu0 %v1572_v2  ;;  %v3706_v44 = vpack.c.bf16 %v1896_v23, %v1895_v1 }
 0x755   :  { %3707 = vmatpush3.bf16.msra.mxu0 %v3706_v44 }
 0x756   :  { %1704 = vmatmul.mubr.f32.gmra.mrb[58].mxu0 %v1407_v0  ;;  %v1914_v0 = vld [vmem:[#allocation13 + $0x198] sm:$0xff] }
 0x757   :  { %1708 = vmatprep.mubr.f32.mxu0 %v1573_v55  ;;  %v3708_v36 = vpack.c.bf16 %v1914_v0, %v1913_v60 }
 0x759   :  { %3709 = vmatprep.subr.bf16.mxu0 %v3708_v36 }
 0x75a   :  { %1709 = vmatmul.mubr.f32.gmra.mrb[60].mxu0 %v1408_v5  ;;  %v1916_v5 = vld [vmem:[#allocation13 + $0x1a8] sm:$0xff] }
 0x75b   :  { %1713 = vmatprep.mubr.f32.mxu0 %v1574_v19  ;;  %3711 = vmatpush3.bf16.msra.mxu0 %v3710_v3 }
 0x75e   :  { %1714 = vmatmul.mubr.f32.gmra.mrb[62].mxu0 %v1409_v30  ;;  %v3712_v30 = vpack.c.bf16 %v1916_v5, %v1915_v28 }
 0x760   :  { %3713 = vmatprep.subr.bf16.mxu0 %v3712_v30 }
 0x761   :  { %3715 = vmatpush3.bf16.msra.mxu0 %v3714_v43 }
 0x762   :  { %3717 = vmatprep.subr.bf16.mxu0 %v3716_v6 }
 0x765   :  { %3719 = vmatpush3.bf16.msra.mxu0 %v3718_v21 }
 0x766   :  { %3721 = vmatprep.subr.bf16.mxu0 %v3720_v25 }
 0x769   :  { %3723 = vmatpush3.bf16.msra.mxu0 %v3722_v49  ;;  %v3865_v49 = vld [vmem:[#allocation8 + $0x28] sm:$0xff]  }
 0x76a   :  { %3725 = vmatprep.subr.bf16.mxu0 %v3724_v22  ;;  %v3866_v22 = vld [vmem:[#allocation8 + $0x30] sm:$0xff]  }
 0x76d   :  { %3727 = vmatpush3.bf16.msra.mxu0 %v3726_v47  ;;  %v1909_v47 = vld [vmem:[#allocation13 + $0x170] sm:$0xff] }
 0x76e   :  { %3729 = vmatprep.subr.bf16.mxu0 %v3728_v18  ;;  %v1910_v18 = vld [vmem:[#allocation13 + $0x178] sm:$0xff] }
 0x76f   :  { %v3734_v12 = vpack.c.bf16 %v1910_v18, %v1909_v47 }
 0x771   :  { %3731 = vmatpush3.bf16.msra.mxu0 %v3730_v50  ;;  %v1849_v50 = vpop.permute.xlu0 %1848 }
 0x772   :  { %3733 = vmatprep.subr.bf16.mxu0 %v3732_v26 }
 0x775   :  { %3735 = vmatpush3.bf16.msra.mxu0 %v3734_v12 }
 0x815   :  { %v3052_v9 = vpop.f32.mrb[48].mxu0 }
 0x816   :  { %v3053_v54 = vpop.f32.mrb[49].mxu0 }
 0x817   :  { %v3054_v57 = vadd.f32 %v3053_v54, %v3052_v9 }
 0x819   :  { %v3055_v61 = vpop.f32.mrb[50].mxu0  ;;  %v4775_v4 = vadd.f32 %v3054_v57, %v2733_v59 }
 0x81a   :  { %v3056_v62 = vpop.f32.mrb[51].mxu0 }
 0x81b   :  { %v3057_v53 = vadd.f32 %v3056_v62, %v3055_v61  ;;  %v1719_v58 = vmax.f32 %v4775_v4, 0.0 }
 0x81d   :  { %v4777_v2 = vadd.f32 %v3057_v53, %v2733_v59  ;;  %v3058_v42 = vpop.f32.mrb[52].mxu0  ;;  %v1859_v53 = vpop.permute.xlu0 %1858 }
 0x81e   :  { %v3059_v55 = vpop.f32.mrb[53].mxu0 }
 0x81f   :  { %v1720_v19 = vmax.f32 %v4777_v2, 0.0  ;;  %v3060_v16 = vadd.f32 %v3059_v55, %v3058_v42 }
 0x821   :  { %v3061_v11 = vpop.f32.mrb[54].mxu0  ;;  %v1745_v63 = vpack.c.bf16 %v1720_v19, %v1719_v58  ;;  %v4785_v24 = vadd.f32 %v3060_v16, %v2733_v59 }
 0x822   :  { %v3062_v1 = vpop.f32.mrb[55].mxu0 }
 0x823   :  { %v3063_v23 = vadd.f32 %v3062_v1, %v3061_v11  ;;  %3436 = vmatprep.subr.bf16.mxu1 %v1745_v63  ;;  %v1721_v36 = vmax.f32 %v4785_v24, 0.0  ;;  %v3868_v24 = vld [vmem:[#allocation8 + $0x40] sm:$0xff]  }
 0x824   :  { %3437 = vmatpush3.bf16.msra.mxu1 %v1745_v63 }
 0x825   :  { %v4787_v60 = vadd.f32 %v3063_v23, %v2733_v59  ;;  %v3064_v0 = vpop.f32.mrb[56].mxu0 }
 0x826   :  { %v3065_v44 = vpop.f32.mrb[57].mxu0 }
 0x827   :  { %v1722_v7 = vmax.f32 %v4787_v60, 0.0  ;;  %v3066_v17 = vadd.f32 %v3065_v44, %v3064_v0  ;;  %v1869_v0 = vpop.permute.xlu0 %1868 }
 0x829   :  { %v3067_v28 = vpop.f32.mrb[58].mxu0  ;;  %v1746_v5 = vpack.c.bf16 %v1722_v7, %v1721_v36  ;;  %v4795_v30 = vadd.f32 %v3066_v17, %v2733_v59 }
 0x82a   :  { %v3068_v3 = vpop.f32.mrb[59].mxu0 }
 0x82b   :  { %v3069_v14 = vadd.f32 %v3068_v3, %v3067_v28  ;;  %3438 = vmatprep.subr.bf16.mxu1 %v1746_v5  ;;  %v1723_v43 = vmax.f32 %v4795_v30, 0.0  ;;  %v1879_v2 = vpop.permute.xlu0 %1878 }
 0x82c   :  { %3439 = vmatpush3.bf16.msra.mxu1 %v1746_v5  ;;  %v2751_v5 = vld [vmem:[%s5039_s13 + $0x1] ss:$0 sm:$0xff] }
 0x82d   :  { %v4797_v41 = vadd.f32 %v3069_v14, %v2733_v59  ;;  %v3070_v33 = vpop.f32.mrb[60].mxu0 }
 0x82e   :  { %v3071_v34 = vpop.f32.mrb[61].mxu0 }
 0x82f   :  { %v1724_v6 = vmax.f32 %v4797_v41, 0.0  ;;  %v3072_v56 = vadd.f32 %v3071_v34, %v3070_v33 }
 0x831   :  { %v3073_v40 = vpop.f32.mrb[62].mxu0  ;;  %v1747_v10 = vpack.c.bf16 %v1724_v6, %v1723_v43  ;;  %v1711_v21 = vadd.f32 %v3072_v56, %v2733_v59 }
 0x832   :  { %v3074_v13 = vpop.f32.mrb[63].mxu0 }
 0x833   :  { %v3075_v25 = vadd.f32 %v3074_v13, %v3073_v40  ;;  %3440 = vmatprep.subr.bf16.mxu1 %v1747_v10  ;;  %v1725_v35 = vmax.f32 %v1711_v21, 0.0 }
 0x834   :  { %3441 = vmatpush3.bf16.msra.mxu1 %v1747_v10 }
 0x835   :  { %v1716_v32 = vadd.f32 %v3075_v25, %v2733_v59  ;;  %v1854_v59 = vpop.permute.xlu1 %1853 }
 0x837   :  { %v1726_v45 = vmax.f32 %v1716_v32, 0.0 }
 0x839   :  { %v1748_v46 = vpack.c.bf16 %v1726_v45, %v1725_v35  ;;  %v1864_v63 = vpop.permute.xlu1 %1863 }
 0x83b   :  { %3442 = vmatprep.subr.bf16.mxu1 %v1748_v46 }
 0x83c   :  { %3443 = vmatpush3.bf16.msra.mxu1 %v1748_v46 }
 0x83f   :  { %3445 = vmatmul.mubr.msk.bf16.vlgmr.msra.gmra.mrb[48].mxu1 %vm354_vm0, %v3865_v49 }
 0x840   :  { %3448 = vmatprep.mubr.msk.bf16.mxu1 %vm354_vm0, %v3866_v22 }
 0x847   :  { %3449 = vmatmul.mubr.msk.bf16.gmra.mrb[52].mxu1 %vm354_vm0, %v3867_v31 }
 0x848   :  { %3460 = vmatprep.mubr.msk.bf16.mxu1 %vm354_vm0, %v3868_v24 }
 0x912   :  { %v3446_v29 = vpop.f32.mrb[48].mxu1 }
 0x913   :  { %v1815_v9 = vpop.f32.mrb[49].mxu1  ;;  %v1888_v42 = vmul.f32 %v3446_v29, %v1859_v53 }
 0x914   :  { %v1886_v54 = vmul.f32 %v1849_v50, %v1815_v9  ;;  %v3447_v57 = vpop.f32.mrb[50].mxu1 }
 0x915   :  { %v1818_v61 = vpop.f32.mrb[51].mxu1  ;;  %v1889_v23 = vmul.f32 %v3447_v57, %v1864_v63 }
 0x916   :  { %v1887_v62 = vmul.f32 %v1854_v59, %v1818_v61  ;;  %1999 = vmatprep.mubr.f32.mxu0 %v1886_v54 }
 0x917   :  { %2000 = vmatmul.mubr.f32.vlgmr.msra.gmra.mrb[64].mxu0 %v1719_v58  ;;  %v1874_v58 = vpop.permute.xlu1 %1873 }
 0x918   :  { %2004 = vmatprep.mubr.f32.mxu0 %v1887_v62 }
 0x91a   :  { %v3450_v55 = vpop.f32.mrb[52].mxu1 }
 0x91b   :  { %v1831_v16 = vpop.f32.mrb[53].mxu1  ;;  %2005 = vmatmul.mubr.f32.gmra.mrb[66].mxu0 %v1720_v19  ;;  %v1892_v19 = vmul.f32 %v3450_v55, %v1879_v2  ;;  %v1884_v17 = vpop.permute.xlu1 %1883  ;;  %v2235_v2 = vld [vmem:[#allocation13 + $0x298] sm:$0xff] }
 0x91c   :  { %v3451_v11 = vpop.f32.mrb[54].mxu1  ;;  %2009 = vmatprep.mubr.f32.mxu0 %v1888_v42  ;;  %v1890_v4 = vmul.f32 %v1869_v0, %v1831_v16  ;;  %v2232_v16 = vld [vmem:[#allocation13 + $0x280] sm:$0xff] }
 0x91d   :  { %v1834_v1 = vpop.f32.mrb[55].mxu1  ;;  %v1893_v28 = vmul.f32 %v3451_v11, %v1884_v17  ;;  %v2233_v11 = vld [vmem:[#allocation13 + $0x288] sm:$0xff]  ;;  %v3870_v17 = vld [vmem:[#allocation8 + $0x50] sm:$0xff]  }
 0x91e   :  { %v1891_v44 = vmul.f32 %v1874_v58, %v1834_v1  ;;  %v3736_v0 = vpack.c.bf16 %v2233_v11, %v2232_v16  ;;  %v2217_v58 = vld [vmem:[#allocation13 + $0x208] sm:$0xff] }
 0x91f   :  { %2010 = vmatmul.mubr.f32.gmra.mrb[68].mxu0 %v1721_v36  ;;  %v2245_v16 = vld [vmem:[#allocation13 + $0x2e8] sm:$0xff] }
 0x920   :  { %2014 = vmatprep.mubr.f32.mxu0 %v1889_v23 }
 0x923   :  { %2015 = vmatmul.mubr.f32.gmra.mrb[70].mxu0 %v1722_v7 }
 0x924   :  { %2019 = vmatprep.mubr.f32.mxu0 %v1890_v4  ;;  %v2216_v4 = vld [vmem:[#allocation13 + $0x200] sm:$0xff] }
 0x927   :  { %2020 = vmatmul.mubr.f32.gmra.mrb[72].mxu0 %v1723_v43 }
 0x928   :  { %2024 = vmatprep.mubr.f32.mxu0 %v1891_v44  ;;  %v2234_v44 = vld [vmem:[#allocation13 + $0x290] sm:$0xff] }
 0x929   :  { %v3740_v24 = vpack.c.bf16 %v2235_v2, %v2234_v44  ;;  %v2246_v44 = vld [vmem:[#allocation13 + $0x2f0] sm:$0xff]  ;;  %v2247_v2 = vld [vmem:[#allocation13 + $0x2f8] sm:$0xff] }
 0x92b   :  { %2025 = vmatmul.mubr.f32.gmra.mrb[74].mxu0 %v1724_v6 }
 0x92c   :  { %2029 = vmatprep.mubr.f32.mxu0 %v1892_v19  ;;  %v3869_v19 = vld [vmem:[#allocation8 + $0x48] sm:$0xff]  }
 0x92f   :  { %2030 = vmatmul.mubr.f32.gmra.mrb[76].mxu0 %v1725_v35 }
 0x930   :  { %2034 = vmatprep.mubr.f32.mxu0 %v1893_v28  ;;  %v3738_v28 = vpack.c.bf16 %v2217_v58, %v2216_v4  ;;  %v2229_v4 = vld [vmem:[#allocation13 + $0x268] sm:$0xff] }
 0x933   :  { %2035 = vmatmul.mubr.f32.gmra.mrb[78].mxu0 %v1726_v45 }
 0x9ea   :  { %v3116_v36 = vpop.f32.mrb[64].mxu0 }
 0x9eb   :  { %v3117_v60 = vpop.f32.mrb[65].mxu0 }
 0x9ec   :  { %v3118_v7 = vadd.f32 %v3117_v60, %v3116_v36  ;;  %v2218_v36 = vld [vmem:[#allocation13 + $0x210] sm:$0xff]  ;;  %v2219_v60 = vld [vmem:[#allocation13 + $0x218] sm:$0xff] }
 0x9ee   :  { %v3119_v3 = vpop.f32.mrb[66].mxu0  ;;  %v4816_v14 = vadd.f32 %v3118_v7, %v2751_v5  ;;  %v2236_v7 = vld [vmem:[#allocation13 + $0x2a0] sm:$0xff] }
 0x9ef   :  { %v3120_v30 = vpop.f32.mrb[67].mxu0 }
 0x9f0   :  { %v3121_v41 = vadd.f32 %v3120_v30, %v3119_v3  ;;  %v2040_v6 = vmax.f32 %v4816_v14, 0.0  ;;  %v3742_v3 = vpack.c.bf16 %v2219_v60, %v2218_v36  ;;  %v2377_v36 = vld [vmem:[%s5040_s14 + $0x80] sm:$0xff]  ;;  %v2378_v60 = vld [vmem:[%s5040_s14 + $0x88] sm:$0xff] }
 0x9f2   :  { %v4818_v33 = vadd.f32 %v3121_v41, %v2751_v5  ;;  %v3122_v34 = vpop.f32.mrb[68].mxu0  ;;  %v2220_v41 = vld [vmem:[#allocation13 + $0x220] sm:$0xff] }
 0x9f3   :  { %v3123_v43 = vpop.f32.mrb[69].mxu0 }
 0x9f4   :  { %v2041_v56 = vmax.f32 %v4818_v33, 0.0  ;;  %v3124_v40 = vadd.f32 %v3123_v43, %v3122_v34  ;;  %v2221_v34 = vld [vmem:[#allocation13 + $0x228] sm:$0xff]  ;;  %v2238_v43 = vld [vmem:[#allocation13 + $0x2b0] sm:$0xff] }
 0x9f6   :  { %v3125_v10 = vpop.f32.mrb[70].mxu0  ;;  %v2066_v13 = vpack.c.bf16 %v2041_v56, %v2040_v6  ;;  %v4826_v25 = vadd.f32 %v3124_v40, %v2751_v5  ;;  %v2239_v40 = vld [vmem:[#allocation13 + $0x2b8] sm:$0xff] }
 0x9f7   :  { %v3126_v21 = vpop.f32.mrb[71].mxu0 }
 0x9f8   :  { %v3127_v32 = vadd.f32 %v3126_v21, %v3125_v10  ;;  %3452 = vmatprep.subr.bf16.mxu1 %v2066_v13  ;;  %v2042_v49 = vmax.f32 %v4826_v25, 0.0  ;;  %v3871_v10 = vld [vmem:[#allocation8 + $0x58] sm:$0xff]   ;;  %v3748_v21 = vpack.c.bf16 %v2239_v40, %v2238_v43  ;;  %v2363_v40 = vld [vmem:[%s5040_s14 + $0x10] sm:$0xff] }
 0x9f9   :  { %3453 = vmatpush3.bf16.msra.mxu1 %v2066_v13  ;;  %v3746_v13 = vpack.c.bf16 %v2221_v34, %v2220_v41  ;;  %v2380_v41 = vld [vmem:[%s5040_s14 + $0x98] sm:$0xff] }
 0x9fa   :  { %v4828_v35 = vadd.f32 %v3127_v32, %v2751_v5  ;;  %v3128_v45 = vpop.f32.mrb[72].mxu0  ;;  %v2222_v32 = vld [vmem:[#allocation13 + $0x230] sm:$0xff] }
 0x9fb   :  { %v3129_v46 = vpop.f32.mrb[73].mxu0 }
 0x9fc   :  { %v2043_v22 = vmax.f32 %v4828_v35, 0.0  ;;  %v3130_v31 = vadd.f32 %v3129_v46, %v3128_v45  ;;  %v2223_v45 = vld [vmem:[#allocation13 + $0x238] sm:$0xff]  ;;  %v2240_v46 = vld [vmem:[#allocation13 + $0x2c0] sm:$0xff] }
 0x9fd   :  { %v2389_v35 = vld [vmem:[%s5040_s14 + $0xe0] sm:$0xff] }
 0x9fe   :  { %v3131_v51 = vpop.f32.mrb[74].mxu0  ;;  %v2067_v20 = vpack.c.bf16 %v2043_v22, %v2042_v49  ;;  %v4836_v47 = vadd.f32 %v3130_v31, %v2751_v5  ;;  %v2241_v31 = vld [vmem:[#allocation13 + $0x2c8] sm:$0xff] }
 0x9ff   :  { %v3132_v26 = vpop.f32.mrb[75].mxu0 }
 0xa00   :  { %v3133_v18 = vadd.f32 %v3132_v26, %v3131_v51  ;;  %3454 = vmatprep.subr.bf16.mxu1 %v2067_v20  ;;  %v2044_v9 = vmax.f32 %v4836_v47, 0.0  ;;  %v3750_v51 = vpack.c.bf16 %v2223_v45, %v2222_v32  ;;  %v2224_v26 = vld [vmem:[#allocation13 + $0x240] sm:$0xff] }
 0xa01   :  { %3455 = vmatpush3.bf16.msra.mxu1 %v2067_v20  ;;  %v3752_v20 = vpack.c.bf16 %v2241_v31, %v2240_v46  ;;  %v2365_v46 = vld [vmem:[%s5040_s14 + $0x20] sm:$0xff]  ;;  %v2366_v31 = vld [vmem:[%s5040_s14 + $0x28] sm:$0xff] }
 0xa02   :  { %v4838_v12 = vadd.f32 %v3133_v18, %v2751_v5  ;;  %v3134_v29 = vpop.f32.mrb[76].mxu0  ;;  %v2225_v18 = vld [vmem:[#allocation13 + $0x248] sm:$0xff] }
 0xa03   :  { %v3135_v50 = vpop.f32.mrb[77].mxu0 }
 0xa04   :  { %v2045_v54 = vmax.f32 %v4838_v12, 0.0  ;;  %v3136_v57 = vadd.f32 %v3135_v50, %v3134_v29  ;;  %v2242_v29 = vld [vmem:[#allocation13 + $0x2d0] sm:$0xff]  ;;  %v2243_v50 = vld [vmem:[#allocation13 + $0x2d8] sm:$0xff]  ;;  %v2373_v12 = vld [vmem:[%s5040_s14 + $0x60] sm:$0xff] }
 0xa06   :  { %v3137_v59 = vpop.f32.mrb[78].mxu0  ;;  %v2068_v61 = vpack.c.bf16 %v2045_v54, %v2044_v9  ;;  %v4846_v53 = vadd.f32 %v3136_v57, %v2751_v5  ;;  %v3754_v57 = vpack.c.bf16 %v2225_v18, %v2224_v26  ;;  %v3778_v26 = vpack.c.bf16 %v2366_v31, %v2365_v46  ;;  %v2521_v31 = vld [vmem:[#allocation14] sm:$0xff] }
 0xa07   :  { %v3138_v62 = vpop.f32.mrb[79].mxu0 }
 0xa08   :  { %v3139_v42 = vadd.f32 %v3138_v62, %v3137_v59  ;;  %3456 = vmatprep.subr.bf16.mxu1 %v2068_v61  ;;  %v2046_v63 = vmax.f32 %v4846_v53, 0.0  ;;  %v3756_v59 = vpack.c.bf16 %v2243_v50, %v2242_v29  ;;  %v2227_v62 = vld [vmem:[#allocation13 + $0x258] sm:$0xff]  ;;  %v2367_v29 = vld [vmem:[%s5040_s14 + $0x30] sm:$0xff] }
 0xa09   :  { %3457 = vmatpush3.bf16.msra.mxu1 %v2068_v61  ;;  %v2226_v61 = vld [vmem:[#allocation13 + $0x250] sm:$0xff]  ;;  %v2368_v50 = vld [vmem:[%s5040_s14 + $0x38] sm:$0xff] }
 0xa0a   :  { %v4848_v55 = vadd.f32 %v3139_v42, %v2751_v5  ;;  %v2237_v5 = vld [vmem:[#allocation13 + $0x2a8] sm:$0xff]  ;;  %v2244_v42 = vld [vmem:[#allocation13 + $0x2e0] sm:$0xff]  ;;  %v3758_v11 = vpack.c.bf16 %v2227_v62, %v2226_v61  ;;  %v3782_v61 = vpack.c.bf16 %v2368_v50, %v2367_v29  ;;  %v2391_v53 = vld [vmem:[%s5040_s14 + $0xf0] sm:$0xff] }
 0xa0b   :  { %v3744_v30 = vpack.c.bf16 %v2237_v5, %v2236_v7  ;;  %v2361_v7 = vld [vmem:[%s5040_s14] sm:$0xff]  ;;  %v3768_v5 = vpack.c.bf16 %v2378_v60, %v2377_v36  ;;  %v2175_v60 = vpop.permute.xlu1 %2174 }
 0xa0c   :  { %v2047_v1 = vmax.f32 %v4848_v55, 0.0  ;;  %v2392_v55 = vld [vmem:[%s5040_s14 + $0xf8] sm:$0xff]  ;;  %v2525_v50 = vld [vmem:[#allocation14 + $0x20] sm:$0xff] }
 0xa0d   :  { %3769 = vmatprep.subr.bf16.mxu0 %v3768_v5 }
 0xa0e   :  { %v2069_v23 = vpack.c.bf16 %v2047_v1, %v2046_v63 }
 0xa10   :  { %3458 = vmatprep.subr.bf16.mxu1 %v2069_v23 }
 0xa11   :  { %3459 = vmatpush3.bf16.msra.mxu1 %v2069_v23  ;;  %v3760_v23 = vpack.c.bf16 %v2245_v16, %v2244_v42  ;;  %v2369_v42 = vld [vmem:[%s5040_s14 + $0x40] sm:$0xff]  ;;  %v2370_v16 = vld [vmem:[%s5040_s14 + $0x48] sm:$0xff] }
 0xa12   :  { %3737 = vmatprep.subr.bf16.mxu1 %v3736_v0  ;;  %v2228_v0 = vld [vmem:[#allocation13 + $0x260] sm:$0xff] }
 0xa13   :  { %v3762_v58 = vpack.c.bf16 %v2229_v4, %v2228_v0  ;;  %v3786_v0 = vpack.c.bf16 %v2370_v16, %v2369_v42  ;;  %v2529_v16 = vld [vmem:[#allocation14 + $0x40] sm:$0xff] }
 0xa14   :  { %3461 = vmatmul.mubr.msk.bf16.vlgmr.msra.gmra.mrb[56].mxu1 %vm354_vm0, %v3869_v19  ;;  %v3764_v19 = vpack.c.bf16 %v2247_v2, %v2246_v44  ;;  %v2372_v44 = vld [vmem:[%s5040_s14 + $0x58] sm:$0xff] }
 0xa15   :  { %3464 = vmatprep.mubr.msk.bf16.mxu1 %vm354_vm0, %v3870_v17  ;;  %3739 = vmatpush3.bf16.msra.mxu1 %v3738_v28  ;;  %v2230_v17 = vld [vmem:[#allocation13 + $0x270] sm:$0xff]  ;;  %v2231_v28 = vld [vmem:[#allocation13 + $0x278] sm:$0xff] }
 0xa16   :  { %3741 = vmatprep.subr.bf16.mxu1 %v3740_v24  ;;  %v3766_v24 = vpack.c.bf16 %v2231_v28, %v2230_v17  ;;  %v2170_v17 = vpop.permute.xlu0 %2169 }
 0xa19   :  { %3743 = vmatpush3.bf16.msra.mxu1 %v3742_v3  ;;  %v2362_v3 = vld [vmem:[%s5040_s14 + $0x8] sm:$0xff] }
 0xa1a   :  { %3745 = vmatprep.subr.bf16.mxu1 %v3744_v30  ;;  %v2379_v30 = vld [vmem:[%s5040_s14 + $0x90] sm:$0xff]  ;;  %v3770_v34 = vpack.c.bf16 %v2362_v3, %v2361_v7  ;;  %v2180_v3 = vpop.permute.xlu0 %2179 }
 0xa1b   :  { %v3772_v43 = vpack.c.bf16 %v2380_v41, %v2379_v30 }
 0xa1c   :  { %3465 = vmatmul.mubr.msk.bf16.gmra.mrb[60].mxu1 %vm354_vm0, %v3871_v10  ;;  %v2364_v10 = vld [vmem:[%s5040_s14 + $0x18] sm:$0xff]  ;;  %3771 = vmatpush3.bf16.msra.mxu0 %v3770_v34 }
 0xa1d   :  { %3747 = vmatpush3.bf16.msra.mxu1 %v3746_v13  ;;  %v2381_v13 = vld [vmem:[%s5040_s14 + $0xa0] sm:$0xff]  ;;  %v3774_v32 = vpack.c.bf16 %v2364_v10, %v2363_v40  ;;  %3773 = vmatprep.subr.bf16.mxu0 %v3772_v43  ;;  %v2185_v40 = vpop.permute.xlu1 %2184 }
 0xa1e   :  { %3749 = vmatprep.subr.bf16.mxu1 %v3748_v21  ;;  %v2382_v21 = vld [vmem:[%s5040_s14 + $0xa8] sm:$0xff] }
 0xa1f   :  { %v3776_v45 = vpack.c.bf16 %v2382_v21, %v2381_v13  ;;  %v2190_v21 = vpop.permute.xlu0 %2189 }
 0xa20   :  { %3775 = vmatpush3.bf16.msra.mxu0 %v3774_v32 }
 0xa21   :  { %3751 = vmatpush3.bf16.msra.mxu1 %v3750_v51  ;;  %v2383_v51 = vld [vmem:[%s5040_s14 + $0xb0] sm:$0xff]  ;;  %3777 = vmatprep.subr.bf16.mxu0 %v3776_v45  ;;  %v2376_v45 = vld [vmem:[%s5040_s14 + $0x78] sm:$0xff] }
 0xa22   :  { %3753 = vmatprep.subr.bf16.mxu1 %v3752_v20  ;;  %v2384_v20 = vld [vmem:[%s5040_s14 + $0xb8] sm:$0xff] }
 0xa23   :  { %v3780_v18 = vpack.c.bf16 %v2384_v20, %v2383_v51  ;;  %v2200_v33 = vpop.permute.xlu0 %2199  ;;  %v2522_v51 = vld [vmem:[#allocation14 + $0x8] sm:$0xff]  ;;  %v2523_v20 = vld [vmem:[#allocation14 + $0x10] sm:$0xff] }
 0xa24   :  { %3779 = vmatpush3.bf16.msra.mxu0 %v3778_v26  ;;  %v3800_v26 = vpack.c.bf16 %v2522_v51, %v2521_v31 }
 0xa25   :  { %3755 = vmatpush3.bf16.msra.mxu1 %v3754_v57  ;;  %v2385_v57 = vld [vmem:[%s5040_s14 + $0xc0] sm:$0xff]  ;;  %3781 = vmatprep.subr.bf16.mxu0 %v3780_v18  ;;  %v2524_v18 = vld [vmem:[#allocation14 + $0x18] sm:$0xff] }
 0xa26   :  { %3757 = vmatprep.subr.bf16.mxu1 %v3756_v59  ;;  %v2386_v59 = vld [vmem:[%s5040_s14 + $0xc8] sm:$0xff]  ;;  %v3804_v29 = vpack.c.bf16 %v2524_v18, %v2523_v20 }
 0xa27   :  { %v3784_v62 = vpack.c.bf16 %v2386_v59, %v2385_v57  ;;  %v2526_v57 = vld [vmem:[#allocation14 + $0x28] sm:$0xff] }
 0xa28   :  { %3783 = vmatpush3.bf16.msra.mxu0 %v3782_v61  ;;  %v3808_v59 = vpack.c.bf16 %v2526_v57, %v2525_v50  ;;  %v2527_v61 = vld [vmem:[#allocation14 + $0x30] sm:$0xff] }
 0xa29   :  { %3759 = vmatpush3.bf16.msra.mxu1 %v3758_v11  ;;  %v2387_v11 = vld [vmem:[%s5040_s14 + $0xd0] sm:$0xff]  ;;  %3785 = vmatprep.subr.bf16.mxu0 %v3784_v62  ;;  %v2528_v62 = vld [vmem:[#allocation14 + $0x38] sm:$0xff] }
 0xa2a   :  { %3761 = vmatprep.subr.bf16.mxu1 %v3760_v23  ;;  %v2388_v23 = vld [vmem:[%s5040_s14 + $0xd8] sm:$0xff]  ;;  %v3812_v42 = vpack.c.bf16 %v2528_v62, %v2527_v61 }
 0xa2b   :  { %v3788_v4 = vpack.c.bf16 %v2388_v23, %v2387_v11  ;;  %v2530_v11 = vld [vmem:[#allocation14 + $0x48] sm:$0xff] }
 0xa2c   :  { %3787 = vmatpush3.bf16.msra.mxu0 %v3786_v0  ;;  %v3816_v23 = vpack.c.bf16 %v2530_v11, %v2529_v16  ;;  %v2531_v0 = vld [vmem:[#allocation14 + $0x50] sm:$0xff] }
 0xa2d   :  { %3763 = vmatpush3.bf16.msra.mxu1 %v3762_v58  ;;  %v2371_v58 = vld [vmem:[%s5040_s14 + $0x50] sm:$0xff]  ;;  %3789 = vmatprep.subr.bf16.mxu0 %v3788_v4  ;;  %v2532_v4 = vld [vmem:[#allocation14 + $0x58] sm:$0xff] }
 0xa2e   :  { %3765 = vmatprep.subr.bf16.mxu1 %v3764_v19  ;;  %v3790_v2 = vpack.c.bf16 %v2372_v44, %v2371_v58  ;;  %v3820_v58 = vpack.c.bf16 %v2532_v4, %v2531_v0  ;;  %v4974_v44 = vld [vmem:[%s5035_s9 + $0x2] ss:$0 sm:$0xff]  ;;  %v2535_v4 = vld [vmem:[#allocation14 + $0x70] sm:$0xff] }
 0xa2f   :  { %v1258_v18 = vadd.f32 %v4751_v39, %v4974_v44  ;;  %v1263_v62 = vadd.f32 %v4753_v48, %v4974_v44  ;;  %v2533_v39 = vld [vmem:[#allocation14 + $0x60] sm:$0xff] }
 0xa30   :  { %3791 = vmatpush3.bf16.msra.mxu0 %v3790_v2  ;;  %v2770_v48 = vld [vmem:[%s5041_s15] ss:$0 sm:$0xff] }
 0xa31   :  { %3767 = vmatpush3.bf16.msra.mxu1 %v3766_v24  ;;  %v2406_v61 = vmax.f32 %v1258_v18, 0.0  ;;  %v2408_v11 = vmax.f32 %v1263_v62, 0.0 }
 0xa32   :  { %3801 = vmatprep.subr.bf16.mxu1 %v3800_v26 }
 0xae7   :  { %v3462_v19 = vpop.f32.mrb[56].mxu1 }
 0xae8   :  { %v2136_v28 = vpop.f32.mrb[57].mxu1  ;;  %v2209_v30 = vmul.f32 %v3462_v19, %v2180_v3  ;;  %v4979_v19 = vld [vmem:[%s5039_s13 + $0x2] ss:$0 sm:$0xff] }
 0xae9   :  { %v2207_v24 = vmul.f32 %v2170_v17, %v2136_v28  ;;  %v3463_v36 = vpop.f32.mrb[58].mxu1 }
 0xaea   :  { %v2139_v7 = vpop.f32.mrb[59].mxu1  ;;  %v2210_v13 = vmul.f32 %v3463_v36, %v2185_v40 }
 0xaeb   :  { %v2208_v5 = vmul.f32 %v2175_v60, %v2139_v7  ;;  %2320 = vmatprep.mubr.f32.mxu1 %v2207_v24  ;;  %v1228_v24 = vadd.f32 %v4739_v38, %v4974_v44  ;;  %v1238_v38 = vadd.f32 %v4743_v52, %v4974_v44 }
 0xaec   :  { %2321 = vmatmul.mubr.f32.vlgmr.msra.gmra.mrb[64].mxu1 %v2040_v6  ;;  %v2195_v6 = vpop.permute.xlu1 %2194 }
 0xaed   :  { %2325 = vmatprep.mubr.f32.mxu1 %v2208_v5  ;;  %3803 = vmatpush3.bf16.msra.mxu1 %v3800_v26 }
 0xaee   :  { %3805 = vmatprep.subr.bf16.mxu1 %v3804_v29 }
 0xaef   :  { %v3466_v41 = vpop.f32.mrb[60].mxu1 }
 0xaf0   :  { %v2152_v34 = vpop.f32.mrb[61].mxu1  ;;  %2326 = vmatmul.mubr.f32.gmra.mrb[66].mxu1 %v2041_v56  ;;  %v2213_v56 = vmul.f32 %v3466_v41, %v2200_v33  ;;  %v2205_v25 = vpop.permute.xlu1 %2204  ;;  %v1233_v41 = vadd.f32 %v4741_v37, %v4974_v44 }
 0xaf1   :  { %v3467_v43 = vpop.f32.mrb[62].mxu1  ;;  %2330 = vmatprep.mubr.f32.mxu1 %v2209_v30  ;;  %v2211_v14 = vmul.f32 %v2190_v21, %v2152_v34  ;;  %3807 = vmatpush3.bf16.msra.mxu1 %v3804_v29  ;;  %v2394_v30 = vmax.f32 %v1228_v24, 0.0 }
 0xaf2   :  { %v2155_v10 = vpop.f32.mrb[63].mxu1  ;;  %3809 = vmatprep.subr.bf16.mxu1 %v3808_v59  ;;  %v2396_v21 = vmax.f32 %v1233_v41, 0.0 }
 0xaf3   :  { %v2212_v32 = vmul.f32 %v2195_v6, %v2155_v10 }
 0xaf4   :  { %2331 = vmatmul.mubr.f32.gmra.mrb[68].mxu1 %v2042_v49  ;;  %v2214_v49 = vmul.f32 %v3467_v43, %v2205_v25  ;;  %v1243_v25 = vadd.f32 %v4745_v8, %v4974_v44 }
 0xaf5   :  { %2335 = vmatprep.mubr.f32.mxu1 %v2210_v13  ;;  %3811 = vmatpush3.bf16.msra.mxu1 %v3808_v59 }
 0xaf6   :  { %3813 = vmatprep.subr.bf16.mxu1 %v3812_v42 }
 0xaf8   :  { %2336 = vmatmul.mubr.f32.gmra.mrb[70].mxu1 %v2043_v22  ;;  %v2390_v22 = vld [vmem:[%s5040_s14 + $0xe8] sm:$0xff] }
 0xaf9   :  { %2340 = vmatprep.mubr.f32.mxu1 %v2211_v14  ;;  %v3792_v47 = vpack.c.bf16 %v2390_v22, %v2389_v35  ;;  %3815 = vmatpush3.bf16.msra.mxu1 %v3812_v42 }
 0xafa   :  { %3817 = vmatprep.subr.bf16.mxu1 %v3816_v23 }
 0xafb   :  { %3793 = vmatprep.subr.bf16.mxu0 %v3792_v47 }
 0xafc   :  { %2341 = vmatmul.mubr.f32.gmra.mrb[72].mxu1 %v2044_v9  ;;  %v2374_v9 = vld [vmem:[%s5040_s14 + $0x68] sm:$0xff] }
 0xafd   :  { %2345 = vmatprep.mubr.f32.mxu1 %v2212_v32  ;;  %3819 = vmatpush3.bf16.msra.mxu1 %v3816_v23  ;;  %v2534_v23 = vld [vmem:[#allocation14 + $0x68] sm:$0xff] }
 0xafe   :  { %3821 = vmatprep.subr.bf16.mxu1 %v3820_v58  ;;  %v3824_v0 = vpack.c.bf16 %v2534_v23, %v2533_v39 }
 0xb00   :  { %2346 = vmatmul.mubr.f32.gmra.mrb[74].mxu1 %v2045_v54  ;;  %v3794_v54 = vpack.c.bf16 %v2374_v9, %v2373_v12  ;;  %v2400_v12 = vmax.f32 %v1243_v25, 0.0  ;;  %v1248_v9 = vadd.f32 %v4747_v15, %v4974_v44 }
 0xb01   :  { %2350 = vmatprep.mubr.f32.mxu1 %v2213_v56  ;;  %3823 = vmatpush3.bf16.msra.mxu1 %v3820_v58  ;;  %v2398_v56 = vmax.f32 %v1238_v38, 0.0  ;;  %v2536_v58 = vld [vmem:[#allocation14 + $0x78] sm:$0xff] }
 0xb02   :  { %3795 = vmatpush3.bf16.msra.mxu0 %v3794_v54  ;;  %3825 = vmatprep.subr.bf16.mxu1 %v3824_v0 }
 0xb04   :  { %2351 = vmatmul.mubr.f32.gmra.mrb[76].mxu1 %v2046_v63  ;;  %v3796_v63 = vpack.c.bf16 %v2392_v55, %v2391_v53 }
 0xb05   :  { %2355 = vmatprep.mubr.f32.mxu1 %v2214_v49  ;;  %3827 = vmatpush3.bf16.msra.mxu1 %v3824_v0 }
 0xb06   :  { %3797 = vmatprep.subr.bf16.mxu0 %v3796_v63 }
 0xb08   :  { %2356 = vmatmul.mubr.f32.gmra.mrb[78].mxu1 %v2047_v1  ;;  %v2375_v1 = vld [vmem:[%s5040_s14 + $0x70] sm:$0xff] }
 0xb09   :  { %v3798_v46 = vpack.c.bf16 %v2376_v45, %v2375_v1  ;;  %v2402_v1 = vmax.f32 %v1248_v9, 0.0  ;;  %v1253_v45 = vadd.f32 %v4749_v27, %v4974_v44  ;;  %v2771_v9 = vld [vmem:[%s5059_s18] ss:$0 sm:$0xff] }
 0xb0b   :  { %3799 = vmatpush3.bf16.msra.mxu0 %v3798_v46  ;;  %v2404_v26 = vmax.f32 %v1253_v45, 0.0 }
 0xbbf   :  { %v3180_v2 = vpop.f32.mrb[64].mxu1 }
 0xbc0   :  { %v3181_v17 = vpop.f32.mrb[65].mxu1 }
 0xbc1   :  { %v3182_v28 = vadd.f32 %v3181_v17, %v3180_v2  ;;  %v3828_v2 = vpack.c.bf16 %v2536_v58, %v2535_v4 }
 0xbc3   :  { %v2323_v36 = vadd.f32 %v3182_v28, %v4979_v19  ;;  %v3183_v60 = vpop.f32.mrb[66].mxu1  ;;  %3829 = vmatprep.subr.bf16.mxu1 %v3828_v2 }
 0xbc4   :  { %v3184_v7 = vpop.f32.mrb[67].mxu1  ;;  %3831 = vmatpush3.bf16.msra.mxu1 %v3828_v2 }
 0xbc5   :  { %v2395_v5 = vmax.f32 %v2323_v36, 0.0  ;;  %v3185_v3 = vadd.f32 %v3184_v7, %v3183_v60 }
 0xbc7   :  { %v2328_v34 = vadd.f32 %v3185_v3, %v4979_v19  ;;  %v3186_v43 = vpop.f32.mrb[68].mxu1  ;;  %2480 = vmatprep.mubr.f32.mxu0 %v2395_v5 }
 0xbc8   :  { %v3187_v40 = vpop.f32.mrb[69].mxu1  ;;  %2481 = vmatmul.mubr.f32.vlgmr.msra.gmra.mrb[80].mxu0 %v2394_v30 }
 0xbc9   :  { %v2397_v10 = vmax.f32 %v2328_v34, 0.0  ;;  %v3188_v13 = vadd.f32 %v3187_v40, %v3186_v43 }
 0xbcb   :  { %v2333_v14 = vadd.f32 %v3188_v13, %v4979_v19  ;;  %v3189_v6 = vpop.f32.mrb[70].mxu1  ;;  %2485 = vmatprep.mubr.f32.mxu0 %v2397_v10 }
 0xbcc   :  { %v3190_v32 = vpop.f32.mrb[71].mxu1  ;;  %2486 = vmatmul.mubr.f32.gmra.mrb[82].mxu0 %v2396_v21 }
 0xbcd   :  { %v2399_v33 = vmax.f32 %v2333_v14, 0.0  ;;  %v3191_v37 = vadd.f32 %v3190_v32, %v3189_v6 }
 0xbcf   :  { %v2338_v49 = vadd.f32 %v3191_v37, %v4979_v19  ;;  %v3192_v35 = vpop.f32.mrb[72].mxu1  ;;  %2490 = vmatprep.mubr.f32.mxu0 %v2399_v33 }
 0xbd0   :  { %v3193_v22 = vpop.f32.mrb[73].mxu1  ;;  %2491 = vmatmul.mubr.f32.gmra.mrb[84].mxu0 %v2398_v56 }
 0xbd1   :  { %v2401_v47 = vmax.f32 %v2338_v49, 0.0  ;;  %v3194_v52 = vadd.f32 %v3193_v22, %v3192_v35 }
 0xbd3   :  { %v2343_v54 = vadd.f32 %v3194_v52, %v4979_v19  ;;  %v3195_v53 = vpop.f32.mrb[74].mxu1  ;;  %2495 = vmatprep.mubr.f32.mxu0 %v2401_v47 }
 0xbd4   :  { %v3196_v55 = vpop.f32.mrb[75].mxu1  ;;  %2496 = vmatmul.mubr.f32.gmra.mrb[86].mxu0 %v2400_v12 }
 0xbd5   :  { %v2403_v63 = vmax.f32 %v2343_v54, 0.0  ;;  %v3197_v8 = vadd.f32 %v3196_v55, %v3195_v53 }
 0xbd7   :  { %v2348_v46 = vadd.f32 %v3197_v8, %v4979_v19  ;;  %v3198_v31 = vpop.f32.mrb[76].mxu1  ;;  %2500 = vmatprep.mubr.f32.mxu0 %v2403_v63 }
 0xbd8   :  { %v3199_v51 = vpop.f32.mrb[77].mxu1  ;;  %2501 = vmatmul.mubr.f32.gmra.mrb[88].mxu0 %v2402_v1 }
 0xbd9   :  { %v2405_v20 = vmax.f32 %v2348_v46, 0.0  ;;  %v3200_v15 = vadd.f32 %v3199_v51, %v3198_v31 }
 0xbdb   :  { %v2353_v29 = vadd.f32 %v3200_v15, %v4979_v19  ;;  %v3201_v50 = vpop.f32.mrb[78].mxu1  ;;  %2505 = vmatprep.mubr.f32.mxu0 %v2405_v20 }
 0xbdc   :  { %v3202_v57 = vpop.f32.mrb[79].mxu1  ;;  %2506 = vmatmul.mubr.f32.gmra.mrb[90].mxu0 %v2404_v26 }
 0xbdd   :  { %v2407_v59 = vmax.f32 %v2353_v29, 0.0  ;;  %v3203_v27 = vadd.f32 %v3202_v57, %v3201_v50 }
 0xbdf   :  { %v2358_v42 = vadd.f32 %v3203_v27, %v4979_v19  ;;  %2510 = vmatprep.mubr.f32.mxu0 %v2407_v59 }
 0xbe0   :  { %2511 = vmatmul.mubr.f32.gmra.mrb[92].mxu0 %v2406_v61 }
 0xbe1   :  { %v2409_v16 = vmax.f32 %v2358_v42, 0.0 }
 0xbe3   :  { %2515 = vmatprep.mubr.f32.mxu0 %v2409_v16 }
 0xbe4   :  { %2516 = vmatmul.mubr.f32.gmra.mrb[94].mxu0 %v2408_v11 }
 0xc9b   :  { %v3236_v17 = vpop.f32.mrb[80].mxu0 }
 0xc9c   :  { %v3237_v44 = vpop.f32.mrb[81].mxu0 }
 0xc9d   :  { %v3238_v19 = vadd.f32 %v3237_v44, %v3236_v17 }
 0xc9f   :  { %v2483_v28 = vadd.f32 %v3238_v19, %v2770_v48  ;;  %v3239_v24 = vpop.f32.mrb[82].mxu0 }
 0xca0   :  { %v3240_v36 = vpop.f32.mrb[83].mxu0 }
 0xca1   :  { %v3241_v60 = vadd.f32 %v3240_v36, %v3239_v24  ;;  %3500 = vmatprep.mubr.f32.mxu1 %v2483_v28 }
 0xca3   :  { %v2488_v7 = vadd.f32 %v3241_v60, %v2770_v48  ;;  %v3242_v5 = vpop.f32.mrb[84].mxu0 }
 0xca4   :  { %v3243_v3 = vpop.f32.mrb[85].mxu0 }
 0xca5   :  { %v3244_v30 = vadd.f32 %v3243_v3, %v3242_v5  ;;  %3501 = vmatmul.mubr.f32.vlgmr.msra.gmra.mrb[80].mxu1 %v2488_v7 }
 0xca7   :  { %v2493_v41 = vadd.f32 %v3244_v30, %v2770_v48  ;;  %v3245_v34 = vpop.f32.mrb[86].mxu0 }
 0xca8   :  { %v3246_v43 = vpop.f32.mrb[87].mxu0 }
 0xca9   :  { %v3247_v40 = vadd.f32 %v3246_v43, %v3245_v34  ;;  %3503 = vmatprep.mubr.f32.mxu1 %v2493_v41 }
 0xcab   :  { %v2498_v10 = vadd.f32 %v3247_v40, %v2770_v48  ;;  %v3248_v13 = vpop.f32.mrb[88].mxu0 }
 0xcac   :  { %v3249_v21 = vpop.f32.mrb[89].mxu0 }
 0xcad   :  { %v3250_v38 = vadd.f32 %v3249_v21, %v3248_v13  ;;  %3504 = vmatmul.mubr.f32.gmra.mrb[82].mxu1 %v2498_v10 }
 0xcaf   :  { %v2503_v14 = vadd.f32 %v3250_v38, %v2770_v48  ;;  %v3251_v6 = vpop.f32.mrb[90].mxu0 }
 0xcb0   :  { %v3252_v32 = vpop.f32.mrb[91].mxu0 }
 0xcb1   :  { %v3253_v33 = vadd.f32 %v3252_v32, %v3251_v6  ;;  %3506 = vmatprep.mubr.f32.mxu1 %v2503_v14 }
 0xcb3   :  { %v2508_v37 = vadd.f32 %v3253_v33, %v2770_v48  ;;  %v3254_v56 = vpop.f32.mrb[92].mxu0 }
 0xcb4   :  { %v3255_v25 = vpop.f32.mrb[93].mxu0 }
 0xcb5   :  { %v3256_v49 = vadd.f32 %v3255_v25, %v3254_v56  ;;  %3507 = vmatmul.mubr.f32.gmra.mrb[84].mxu1 %v2508_v37 }
 0xcb7   :  { %v2513_v35 = vadd.f32 %v3256_v49, %v2770_v48  ;;  %v3257_v22 = vpop.f32.mrb[94].mxu0 }
 0xcb8   :  { %v3258_v47 = vpop.f32.mrb[95].mxu0 }
 0xcb9   :  { %v3259_v52 = vadd.f32 %v3258_v47, %v3257_v22  ;;  %3509 = vmatprep.mubr.f32.mxu1 %v2513_v35 }
 0xcbb   :  { %v2518_v12 = vadd.f32 %v3259_v52, %v2770_v48 }
 0xcbd   :  { %3510 = vmatmul.mubr.f32.gmra.mrb[86].mxu1 %v2518_v12 }
 0xd78   :  { %v3502_v54 = vpop.f32.mrb[80].mxu1 }
 0xd79   :  { %v2616_v53 = vadd.f32 %v3502_v54, %v2771_v9  ;;  %v2610_v55 = vpop.f32.mrb[81].mxu1 }
 0xd7a   :  { %v2611_v63 = vadd.f32 %v2771_v9, %v2610_v55 }
 0xd7b   :  { %2650 = vst [vmem:[#allocation16 + $0x8] sm:$0xff] %v2616_v53 }
 0xd7c   :  { %2649 = vst [vmem:[#allocation16] sm:$0xff] %v2611_v63 }
 0xd80   :  { %v3505_v8 = vpop.f32.mrb[82].mxu1 }
 0xd81   :  { %v2626_v1 = vadd.f32 %v3505_v8, %v2771_v9  ;;  %v2620_v45 = vpop.f32.mrb[83].mxu1 }
 0xd82   :  { %v2621_v46 = vadd.f32 %v2771_v9, %v2620_v45 }
 0xd83   :  { %2652 = vst [vmem:[#allocation16 + $0x18] sm:$0xff] %v2626_v1 }
 0xd84   :  { %2651 = vst [vmem:[#allocation16 + $0x10] sm:$0xff] %v2621_v46 }
 0xd88   :  { %v3508_v31 = vpop.f32.mrb[84].mxu1 }
 0xd89   :  { %v2636_v51 = vadd.f32 %v3508_v31, %v2771_v9  ;;  %v2630_v20 = vpop.f32.mrb[85].mxu1 }
 0xd8a   :  { %v2631_v15 = vadd.f32 %v2771_v9, %v2630_v20 }
 0xd8b   :  { %2654 = vst [vmem:[#allocation16 + $0x28] sm:$0xff] %v2636_v51 }
 0xd8c   :  { %2653 = vst [vmem:[#allocation16 + $0x20] sm:$0xff] %v2631_v15 }
 0xd90   :  { %v3511_v26 = vpop.f32.mrb[86].mxu1 }
 0xd91   :  { %v2646_v18 = vadd.f32 %v3511_v26, %v2771_v9  ;;  %v2640_v29 = vpop.f32.mrb[87].mxu1 }
 0xd92   :  { %v2641_v50 = vadd.f32 %v2771_v9, %v2640_v29 }
 0xd93   :  { %2656 = vst [vmem:[#allocation16 + $0x38] sm:$0xff] %v2646_v18 }
 0xd94   :  { %2655 = vst [vmem:[#allocation16 + $0x30] sm:$0xff] %v2641_v50 }
 0xd95   :  { %4059 = shalt.err (!%p4056_p12)
}
 0xd96   :  { %s5060_s30 = sld [smem:[#allocation27_spill]] }
 0xd9c   :  { %s4060_s20 = scalar_lea.hbm %s5060_s30, 1024 }
 0xd9d   :  { %p4061_p13 = scmp.ne.s32.totalorder %s5060_s30, %s4060_s20  ;;  %p4064_p0 = scmp.lt.u32.totalorder %s4060_s20, %s5060_s30 }
 0xd9f   :  { %p4066_p1 = pnand %p4064_p0, %p4061_p13 }
 0xda1   :  { %4069 = shalt.err (!%p4066_p1)
}
 0xda2   :  { %2668 = dma.vmem_to_hbm [thread:$0]  %s2663_s8, 1024, %s5060_s30, [#allocation4], %s4083_s23, %s4083_s23, %s4084_s24  }
 0xda3   :  { %4080 = dma.done.wait [#allocation4], 1024  }
 0xda4   :  { %4081 = vsyncadd [#allocation4], 4294966272 }
 0xda5   :  { %2672 = vsyncpa [#allocation3], 1 }
 0xda6   :  { %2673 = vsyncpa [#allocation6], 1 }
 0xda7   :  { %2674 = vsyncpa [#allocation9], 1 }
 0xda8   :  { %2675 = vsyncpa [#allocation12], 1 }
 0xda9   :  { %2676 = vsyncpa [#allocation15], 1 }
 0xdaa   :  { %2677 = vsyncpa [#allocation4], 1 }

</bundles_post_ra>
